<compile_context>
chip_gen: v7x
topology: tpu7x:2x2x1
jax: 0.10.0
libtpu: 0.0.40
codegen_flags: <defaults>
</compile_context>

<pallas_src>
import functools

import numpy as np
import jax
import jax.numpy as jnp
from jax import lax
from jax.experimental import pallas as pl
from jax.experimental.pallas import tpu as pltpu


def _round_up(x, m):
    return ((x + m - 1) // m) * m


# ----------------------------------------------------------------------------
# Fused kernel: BiLSTM recurrence + bottleneck + gumbel-softmax + decode.
# All 2-D, time-major rows (row = t * Bp + b), Bp = batch padded to 8.
# G / C dims arrive pre-padded to 128-lane multiples (zero-padded weights).
# ----------------------------------------------------------------------------
def _gumbel_blstm_kernel(x_ref, wih_f_ref, whh_f_ref, b_f_ref,
                         wih_b_ref, whh_b_ref, b_b_ref,
                         wb_ref, bb_ref, wd_ref, gum_ref,
                         in_logit_ref, logit_ref,
                         xf_proj, xb_proj, e_sc,
                         *, seq_len, batch, hidden, inv_temp, n_gumbel):
    T, Bp, H = seq_len, batch, hidden
    Gp = bb_ref.shape[-1]

    # ---- Stage 1: hoisted input projections (one big MXU matmul / direction).
    x = x_ref[...]                                                  # (T*Bp, F)
    xf_proj[...] = (jnp.dot(x, wih_f_ref[...],
                            preferred_element_type=jnp.float32) + b_f_ref[...])
    xb_proj[...] = (jnp.dot(x, wih_b_ref[...],
                            preferred_element_type=jnp.float32) + b_b_ref[...])

    # Loop-invariant weight loads hoisted out of the recurrence.
    whh_f = whh_f_ref[...]                                          # (H, 4H)
    whh_b = whh_b_ref[...]                                          # (H, 4H)

    def lstm_cell(pre, c):
        # pre: (Bp, 4H), PyTorch gate order i, f, g, o
        i = jax.nn.sigmoid(pre[:, 0:H])
        f = jax.nn.sigmoid(pre[:, H:2 * H])
        g = jnp.tanh(pre[:, 2 * H:3 * H])
        o = jax.nn.sigmoid(pre[:, 3 * H:4 * H])
        c_new = f * c + i * g
        h_new = o * jnp.tanh(c_new)
        return h_new, c_new

    def step(t, carry):
        hf, cf, hb, cb = carry
        # forward direction: t = 0 .. T-1
        row_f = pl.multiple_of(t * Bp, Bp)
        pre_f = xf_proj[pl.ds(row_f, Bp), :] + jnp.dot(
            hf, whh_f, preferred_element_type=jnp.float32)
        hf, cf = lstm_cell(pre_f, cf)
        e_sc[pl.ds(row_f, Bp), pl.ds(0, H)] = hf
        # backward direction: processes t = T-1 .. 0
        tr = T - 1 - t
        row_b = pl.multiple_of(tr * Bp, Bp)
        pre_b = xb_proj[pl.ds(row_b, Bp), :] + jnp.dot(
            hb, whh_b, preferred_element_type=jnp.float32)
        hb, cb = lstm_cell(pre_b, cb)
        e_sc[pl.ds(row_b, Bp), pl.ds(H, H)] = hb
        return hf, cf, hb, cb

    z = jnp.zeros((Bp, H), jnp.float32)
    lax.fori_loop(0, T, step, (z, z, z, z), unroll=True)

    # ---- Stage 2 (fused head): bottleneck + gumbel-softmax + decode.
    embed = e_sc[...]                                               # (T*Bp, 2H)
    in_logit = (jnp.dot(embed, wb_ref[...],
                        preferred_element_type=jnp.float32) + bb_ref[...])
    in_logit_ref[...] = in_logit.astype(in_logit_ref.dtype)

    y = (in_logit + gum_ref[...]) * inv_temp
    if n_gumbel < Gp:
        # Padded gumbel columns (weights/bias/noise are zero there) must not
        # participate in the softmax.
        lane = lax.broadcasted_iota(jnp.int32, y.shape, 1)
        y = jnp.where(lane < n_gumbel, y, jnp.float32(-1e30))
    m = jnp.max(y, axis=-1, keepdims=True)
    e = jnp.exp(y - m)
    s = jnp.sum(e, axis=-1, keepdims=True)
    enc = e * pl.reciprocal(s, approx=True)
    logit_ref[...] = jnp.dot(enc, wd_ref[...],
                             preferred_element_type=jnp.float32
                             ).astype(logit_ref.dtype)


def gumbel_blstm_pallas(x_2d, gum_2d, params, temp, *, seq_len, batch_padded,
                        n_gumbel):
    TBp, F = x_2d.shape
    H = params["whh_f"].shape[0]
    Gp = params["wb"].shape[-1]          # padded gumbel dim (128-multiple)
    Cp = params["wd"].shape[-1]          # padded class dim (128-multiple)

    kern = functools.partial(_gumbel_blstm_kernel, seq_len=seq_len,
                             batch=batch_padded, hidden=H,
                             inv_temp=float(1.0 / temp), n_gumbel=n_gumbel)
    full2 = lambda i: (0, 0)

    return pl.pallas_call(
        kern,
        grid=(1,),
        out_shape=(jax.ShapeDtypeStruct((TBp, Gp), jnp.float32),
                   jax.ShapeDtypeStruct((TBp, Cp), jnp.float32)),
        in_specs=[
            pl.BlockSpec((TBp, F), full2),          # x (time-major rows)
            pl.BlockSpec((F, 4 * H), full2),        # wih_f
            pl.BlockSpec((H, 4 * H), full2),        # whh_f
            pl.BlockSpec((1, 4 * H), full2),        # b_f (= b_ih + b_hh)
            pl.BlockSpec((F, 4 * H), full2),        # wih_b
            pl.BlockSpec((H, 4 * H), full2),        # whh_b
            pl.BlockSpec((1, 4 * H), full2),        # b_b
            pl.BlockSpec((2 * H, Gp), full2),       # bottleneck weight^T (padded)
            pl.BlockSpec((1, Gp), full2),           # bottleneck bias (padded)
            pl.BlockSpec((Gp, Cp), full2),          # decode weight^T (padded)
            pl.BlockSpec((TBp, Gp), full2),         # gumbel noise (padded)
        ],
        out_specs=(pl.BlockSpec((TBp, Gp), full2),
                   pl.BlockSpec((TBp, Cp), full2)),
        scratch_shapes=[pltpu.VMEM((TBp, 4 * H), jnp.float32),   # xf_proj
                        pltpu.VMEM((TBp, 4 * H), jnp.float32),   # xb_proj
                        pltpu.VMEM((TBp, 2 * H), jnp.float32)],  # [hf | hb]
        compiler_params=pltpu.CompilerParams(
            dimension_semantics=("arbitrary",)),
    )(x_2d, params["wih_f"], params["whh_f"], params["b_f"],
      params["wih_b"], params["whh_b"], params["b_b"],
      params["wb"], params["bias_b"], params["wd"], gum_2d)


# ----------------------------------------------------------------------------
# Full forward (layout glue + the fused kernel). Gumbel noise is sampled with
# jax.random in the wrapper (RNG glue) and consumed inside the kernel.
# ----------------------------------------------------------------------------
def gumbel_blstm_forward(x_bft, params, gumbel_btg, temp=1.0):
    # x: (B, input_size, T) exactly like the PyTorch module's input
    B, F, T = x_bft.shape
    G = params["wb"].shape[-1]
    C = params["wd"].shape[-1]
    Bp = _round_up(max(B, 8), 8)        # pad batch to a sublane multiple
    Gp = _round_up(max(G, 128), 128)    # lane-dense head / output stores
    Cp = _round_up(max(C, 128), 128)

    x_tbf = jnp.transpose(x_bft, (2, 0, 1))                    # (T, B, F)
    x_tbf = jnp.pad(x_tbf, ((0, 0), (0, Bp - B), (0, 0)))
    x_2d = x_tbf.reshape(T * Bp, F)

    gum_tbg = jnp.transpose(gumbel_btg, (1, 0, 2))             # (T, B, G)
    gum_tbg = jnp.pad(gum_tbg, ((0, 0), (0, Bp - B), (0, Gp - G)))
    gum_2d = gum_tbg.reshape(T * Bp, Gp)

    # Zero-pad head weights to lane-dense widths (done outside the kernel).
    padded = dict(params)
    padded["wb"] = jnp.pad(params["wb"], ((0, 0), (0, Gp - G)))
    padded["bias_b"] = jnp.pad(params["bias_b"], ((0, 0), (0, Gp - G)))
    padded["wd"] = jnp.pad(params["wd"], ((0, Gp - G), (0, Cp - C)))

    in_logit_2d, logit_2d = gumbel_blstm_pallas(
        x_2d, gum_2d, padded, temp, seq_len=T, batch_padded=Bp, n_gumbel=G)

    in_logit = jnp.transpose(
        in_logit_2d.reshape(T, Bp, Gp)[:, :B, :G], (1, 0, 2))
    logit = jnp.transpose(
        logit_2d.reshape(T, Bp, Cp)[:, :B, :C], (1, 0, 2))
    return in_logit, logit


# ----------------------------------------------------------------------------
# Deterministic synthetic parameter init (shapes from the module __init__),
# with fused per-direction gate weights (PyTorch gate order i, f, g, o).
# ----------------------------------------------------------------------------
def init_params(key, input_size, K, n_gumbel, n_class):
    ks = jax.random.split(key, 9)
    s_rnn = 1.0 / np.sqrt(K)
    s_bn = 1.0 / np.sqrt(2 * K)
    s_dec = 1.0 / np.sqrt(n_gumbel)

    def u(k, shape, sc):
        return jax.random.uniform(k, shape, jnp.float32, -sc, sc)

    return dict(
        wih_f=u(ks[0], (input_size, 4 * K), s_rnn),
        whh_f=u(ks[1], (K, 4 * K), s_rnn),
        b_f=u(ks[2], (1, 4 * K), s_rnn),          # b_ih + b_hh pre-summed
        wih_b=u(ks[3], (input_size, 4 * K), s_rnn),
        whh_b=u(ks[4], (K, 4 * K), s_rnn),
        b_b=u(ks[5], (1, 4 * K), s_rnn),
        wb=u(ks[6], (2 * K, n_gumbel), s_bn),      # bottleneck.weight.T
        bias_b=u(ks[7], (1, n_gumbel), s_bn),
        wd=u(ks[8], (n_gumbel, n_class), s_dec),   # decode.weight.T (no bias)
    )


# ----------------------------------------------------------------------------
# Pure-JAX reference of the same forward (for a correctness sanity check).
# ----------------------------------------------------------------------------
def ref_forward(x_bft, params, gumbel_btg, temp):
    x_tbf = jnp.transpose(x_bft, (2, 0, 1))                   # (T, B, F)
    T, B, F = x_tbf.shape
    H = params["whh_f"].shape[0]

    def cell(x_t, h, c, wih, whh, b):
        pre = x_t @ wih + h @ whh + b
        i = jax.nn.sigmoid(pre[:, :H])
        f = jax.nn.sigmoid(pre[:, H:2 * H])
        g = jnp.tanh(pre[:, 2 * H:3 * H])
        o = jax.nn.sigmoid(pre[:, 3 * H:])
        c_new = f * c + i * g
        return o * jnp.tanh(c_new), c_new

    h0 = jnp.zeros((B, H), jnp.float32)
    c0 = jnp.zeros((B, H), jnp.float32)

    def scan_f(carry, x_t):
        h, c = cell(x_t, carry[0], carry[1],
                    params["wih_f"], params["whh_f"], params["b_f"])
        return (h, c), h

    def scan_b(carry, x_t):
        h, c = cell(x_t, carry[0], carry[1],
                    params["wih_b"], params["whh_b"], params["b_b"])
        return (h, c), h

    _, hs_f = lax.scan(scan_f, (h0, c0), x_tbf)
    _, hs_b_rev = lax.scan(scan_b, (h0, c0), x_tbf[::-1])
    hs_b = hs_b_rev[::-1]
    embed = jnp.concatenate([hs_f, hs_b], axis=-1)            # (T, B, 2H)
    embed = jnp.transpose(embed, (1, 0, 2))                   # (B, T, 2H)

    in_logit = embed @ params["wb"] + params["bias_b"]
    y = (in_logit + gumbel_btg) / temp
    enc = jax.nn.softmax(y, axis=-1)
    logit = enc @ params["wd"]
    return in_logit, logit


if __name__ == "__main__":
    # Small shapes consistent with the module: B=2, input_size=16, T=8,
    # embedding_dim K=32 (so fused gate dim 4K = 128 lanes), n_gumbel_units=16,
    # n_class=16.
    B, T = 2, 8
    input_size, K, G, C = 16, 32, 16, 16
    temp = 1.0

    key = jax.random.PRNGKey(0)
    kx, kp, kg = jax.random.split(key, 3)
    x = jax.random.normal(kx, (B, input_size, T), jnp.float32)
    params = init_params(kp, input_size, K, G, C)
    gumbel_noise = jax.random.gumbel(kg, (B, T, G), dtype=jnp.float32)

    in_logit, logit = jax.block_until_ready(
        gumbel_blstm_forward(x, params, gumbel_noise, temp))

    # sanity check vs pure-JAX reference
    in_logit_ref, logit_ref = ref_forward(x, params, gumbel_noise, temp)
    np.testing.assert_allclose(np.asarray(in_logit), np.asarray(in_logit_ref),
                               rtol=2e-3, atol=2e-3)
    np.testing.assert_allclose(np.asarray(logit), np.asarray(logit_ref),
                               rtol=1e-2, atol=1e-2)

    print("KERNEL_OK")
</pallas_src>

<mosaic_0001>
module attributes {stable_mosaic.version = 11 : i64} {
  func.func @_gumbel_blstm_kernel(%arg0: i32, %arg1: memref<64x16xf32, #tpu.memory_space<vmem>>, %arg2: memref<16x128xf32, #tpu.memory_space<vmem>>, %arg3: memref<32x128xf32, #tpu.memory_space<vmem>>, %arg4: memref<1x128xf32, #tpu.memory_space<vmem>>, %arg5: memref<16x128xf32, #tpu.memory_space<vmem>>, %arg6: memref<32x128xf32, #tpu.memory_space<vmem>>, %arg7: memref<1x128xf32, #tpu.memory_space<vmem>>, %arg8: memref<64x128xf32, #tpu.memory_space<vmem>>, %arg9: memref<1x128xf32, #tpu.memory_space<vmem>>, %arg10: memref<128x128xf32, #tpu.memory_space<vmem>>, %arg11: memref<64x128xf32, #tpu.memory_space<vmem>>, %arg12: memref<64x128xf32, #tpu.memory_space<vmem>>, %arg13: memref<64x128xf32, #tpu.memory_space<vmem>>, %arg14: memref<64x128xf32, #tpu.memory_space<vmem>>, %arg15: memref<64x128xf32, #tpu.memory_space<vmem>>, %arg16: memref<64x64xf32, #tpu.memory_space<vmem>>) attributes {dimension_semantics = [#tpu.dimension_semantics<arbitrary>], iteration_bounds = array<i64: 1>, scalar_prefetch = 0 : i64, scratch_operands = 3 : i64, tpu.core_type = #tpu.core_type<tc>, window_params = [{pipeline_mode = #tpu.pipeline_mode<synchronous>, transform_indices = @transform_0, window_bounds = array<i64: 64, 16>}, {pipeline_mode = #tpu.pipeline_mode<synchronous>, transform_indices = @transform_1, window_bounds = array<i64: 16, 128>}, {pipeline_mode = #tpu.pipeline_mode<synchronous>, transform_indices = @transform_2, window_bounds = array<i64: 32, 128>}, {pipeline_mode = #tpu.pipeline_mode<synchronous>, transform_indices = @transform_3, window_bounds = array<i64: 1, 128>}, {pipeline_mode = #tpu.pipeline_mode<synchronous>, transform_indices = @transform_4, window_bounds = array<i64: 16, 128>}, {pipeline_mode = #tpu.pipeline_mode<synchronous>, transform_indices = @transform_5, window_bounds = array<i64: 32, 128>}, {pipeline_mode = #tpu.pipeline_mode<synchronous>, transform_indices = @transform_6, window_bounds = array<i64: 1, 128>}, {pipeline_mode = #tpu.pipeline_mode<synchronous>, transform_indices = @transform_7, window_bounds = array<i64: 64, 128>}, {pipeline_mode = #tpu.pipeline_mode<synchronous>, transform_indices = @transform_8, window_bounds = array<i64: 1, 128>}, {pipeline_mode = #tpu.pipeline_mode<synchronous>, transform_indices = @transform_9, window_bounds = array<i64: 128, 128>}, {pipeline_mode = #tpu.pipeline_mode<synchronous>, transform_indices = @transform_10, window_bounds = array<i64: 64, 128>}, {pipeline_mode = #tpu.pipeline_mode<synchronous>, transform_indices = @transform_11, window_bounds = array<i64: 64, 128>}, {pipeline_mode = #tpu.pipeline_mode<synchronous>, transform_indices = @transform_12, window_bounds = array<i64: 64, 128>}]} {
    %c0 = arith.constant 0 : index
    %c0_0 = arith.constant 0 : index
    %0 = vector.load %arg1[%c0, %c0_0] : memref<64x16xf32, #tpu.memory_space<vmem>>, vector<64x16xf32>
    %c0_1 = arith.constant 0 : index
    %c0_2 = arith.constant 0 : index
    %1 = vector.load %arg2[%c0_1, %c0_2] : memref<16x128xf32, #tpu.memory_space<vmem>>, vector<16x128xf32>
    %cst = arith.constant dense<0.000000e+00> : vector<64x128xf32>
    %2 = tpu.matmul %0, %1, %cst {dimension_numbers = #tpu.dot_dimension_numbers<[1], [0], [0], [1], [0, 0, 1, 1], [], []>} : vector<64x16xf32>, vector<16x128xf32>, vector<64x128xf32> -> vector<64x128xf32>
    %c0_3 = arith.constant 0 : index
    %c0_4 = arith.constant 0 : index
    %3 = vector.load %arg4[%c0_3, %c0_4] : memref<1x128xf32, #tpu.memory_space<vmem>>, vector<1x128xf32>
    %4 = vector.broadcast %3 : vector<1x128xf32> to vector<64x128xf32>
    %5 = arith.addf %2, %4 : vector<64x128xf32>
    %c0_5 = arith.constant 0 : index
    %c0_6 = arith.constant 0 : index
    %6 = vector.load %arg14[%c0_5, %c0_6] : memref<64x128xf32, #tpu.memory_space<vmem>>, vector<64x128xf32>
    tpu.vector_store %arg14[%c0_5, %c0_6], %5 {strides = array<i32>} : memref<64x128xf32, #tpu.memory_space<vmem>>, vector<64x128xf32>,
    %c0_7 = arith.constant 0 : index
    %c0_8 = arith.constant 0 : index
    %7 = vector.load %arg5[%c0_7, %c0_8] : memref<16x128xf32, #tpu.memory_space<vmem>>, vector<16x128xf32>
    %cst_9 = arith.constant dense<0.000000e+00> : vector<64x128xf32>
    %8 = tpu.matmul %0, %7, %cst_9 {dimension_numbers = #tpu.dot_dimension_numbers<[1], [0], [0], [1], [0, 0, 1, 1], [], []>} : vector<64x16xf32>, vector<16x128xf32>, vector<64x128xf32> -> vector<64x128xf32>
    %c0_10 = arith.constant 0 : index
    %c0_11 = arith.constant 0 : index
    %9 = vector.load %arg7[%c0_10, %c0_11] : memref<1x128xf32, #tpu.memory_space<vmem>>, vector<1x128xf32>
    %10 = vector.broadcast %9 : vector<1x128xf32> to vector<64x128xf32>
    %11 = arith.addf %8, %10 : vector<64x128xf32>
    %c0_12 = arith.constant 0 : index
    %c0_13 = arith.constant 0 : index
    %12 = vector.load %arg15[%c0_12, %c0_13] : memref<64x128xf32, #tpu.memory_space<vmem>>, vector<64x128xf32>
    tpu.vector_store %arg15[%c0_12, %c0_13], %11 {strides = array<i32>} : memref<64x128xf32, #tpu.memory_space<vmem>>, vector<64x128xf32>,
    %c0_14 = arith.constant 0 : index
    %c0_15 = arith.constant 0 : index
    %13 = vector.load %arg3[%c0_14, %c0_15] : memref<32x128xf32, #tpu.memory_space<vmem>>, vector<32x128xf32>
    %c0_16 = arith.constant 0 : index
    %c0_17 = arith.constant 0 : index
    %14 = vector.load %arg6[%c0_16, %c0_17] : memref<32x128xf32, #tpu.memory_space<vmem>>, vector<32x128xf32>
    %cst_18 = arith.constant 0.000000e+00 : f32
    %15 = vector.broadcast %cst_18 : f32 to vector<8x32xf32>
    %c0_i32 = arith.constant 0 : i32
    %c8_i32 = arith.constant 8 : i32
    %16 = arith.muli %c0_i32, %c8_i32 : i32
    %17 = tpu.assume_multiple %16, 8 : i32
    %18 = arith.index_cast %17 : i32 to index
    %c0_19 = arith.constant 0 : index
    %19 = vector.load %arg14[%18, %c0_19] : memref<64x128xf32, #tpu.memory_space<vmem>>, vector<8x128xf32>
    %cst_20 = arith.constant dense<0.000000e+00> : vector<8x128xf32>
    %20 = tpu.matmul %15, %13, %cst_20 {dimension_numbers = #tpu.dot_dimension_numbers<[1], [0], [0], [1], [0, 0, 1, 1], [], []>} : vector<8x32xf32>, vector<32x128xf32>, vector<8x128xf32> -> vector<8x128xf32>
    %21 = arith.addf %19, %20 : vector<8x128xf32>
    %22 = vector.extract_strided_slice %21 {offsets = [0, 0], sizes = [8, 32], strides = [1, 1]} : vector<8x128xf32> to vector<8x32xf32>
    %23 = arith.negf %22 : vector<8x32xf32>
    %24 = math.exp %23 : vector<8x32xf32>
    %cst_21 = arith.constant 1.000000e+00 : f32
    %25 = vector.broadcast %cst_21 : f32 to vector<8x32xf32>
    %26 = arith.addf %25, %24 : vector<8x32xf32>
    %27 = arith.divf %25, %26 : vector<8x32xf32>
    %28 = vector.extract_strided_slice %21 {offsets = [0, 32], sizes = [8, 32], strides = [1, 1]} : vector<8x128xf32> to vector<8x32xf32>
    %29 = arith.negf %28 : vector<8x32xf32>
    %30 = math.exp %29 : vector<8x32xf32>
    %cst_22 = arith.constant 1.000000e+00 : f32
    %31 = vector.broadcast %cst_22 : f32 to vector<8x32xf32>
    %32 = arith.addf %31, %30 : vector<8x32xf32>
    %33 = arith.divf %31, %32 : vector<8x32xf32>
    %34 = vector.extract_strided_slice %21 {offsets = [0, 64], sizes = [8, 32], strides = [1, 1]} : vector<8x128xf32> to vector<8x32xf32>
    %35 = math.tanh %34 : vector<8x32xf32>
    %36 = vector.extract_strided_slice %21 {offsets = [0, 96], sizes = [8, 32], strides = [1, 1]} : vector<8x128xf32> to vector<8x32xf32>
    %37 = arith.negf %36 : vector<8x32xf32>
    %38 = math.exp %37 : vector<8x32xf32>
    %cst_23 = arith.constant 1.000000e+00 : f32
    %39 = vector.broadcast %cst_23 : f32 to vector<8x32xf32>
    %40 = arith.addf %39, %38 : vector<8x32xf32>
    %41 = arith.divf %39, %40 : vector<8x32xf32>
    %42 = arith.mulf %33, %15 : vector<8x32xf32>
    %43 = arith.mulf %27, %35 : vector<8x32xf32>
    %44 = arith.addf %42, %43 : vector<8x32xf32>
    %45 = math.tanh %44 : vector<8x32xf32>
    %46 = arith.mulf %41, %45 : vector<8x32xf32>
    %47 = arith.index_cast %17 : i32 to index
    %c0_24 = arith.constant 0 : index
    %48 = vector.load %arg16[%47, %c0_24] : memref<64x64xf32, #tpu.memory_space<vmem>>, vector<8x32xf32>
    tpu.vector_store %arg16[%47, %c0_24], %46 {strides = array<i32>} : memref<64x64xf32, #tpu.memory_space<vmem>>, vector<8x32xf32>,
    %c7_i32 = arith.constant 7 : i32
    %49 = arith.subi %c7_i32, %c0_i32 : i32
    %c8_i32_25 = arith.constant 8 : i32
    %50 = arith.muli %49, %c8_i32_25 : i32
    %51 = tpu.assume_multiple %50, 8 : i32
    %52 = arith.index_cast %51 : i32 to index
    %c0_26 = arith.constant 0 : index
    %53 = vector.load %arg15[%52, %c0_26] : memref<64x128xf32, #tpu.memory_space<vmem>>, vector<8x128xf32>
    %cst_27 = arith.constant dense<0.000000e+00> : vector<8x128xf32>
    %54 = tpu.matmul %15, %14, %cst_27 {dimension_numbers = #tpu.dot_dimension_numbers<[1], [0], [0], [1], [0, 0, 1, 1], [], []>} : vector<8x32xf32>, vector<32x128xf32>, vector<8x128xf32> -> vector<8x128xf32>
    %55 = arith.addf %53, %54 : vector<8x128xf32>
    %56 = vector.extract_strided_slice %55 {offsets = [0, 0], sizes = [8, 32], strides = [1, 1]} : vector<8x128xf32> to vector<8x32xf32>
    %57 = arith.negf %56 : vector<8x32xf32>
    %58 = math.exp %57 : vector<8x32xf32>
    %cst_28 = arith.constant 1.000000e+00 : f32
    %59 = vector.broadcast %cst_28 : f32 to vector<8x32xf32>
    %60 = arith.addf %59, %58 : vector<8x32xf32>
    %61 = arith.divf %59, %60 : vector<8x32xf32>
    %62 = vector.extract_strided_slice %55 {offsets = [0, 32], sizes = [8, 32], strides = [1, 1]} : vector<8x128xf32> to vector<8x32xf32>
    %63 = arith.negf %62 : vector<8x32xf32>
    %64 = math.exp %63 : vector<8x32xf32>
    %cst_29 = arith.constant 1.000000e+00 : f32
    %65 = vector.broadcast %cst_29 : f32 to vector<8x32xf32>
    %66 = arith.addf %65, %64 : vector<8x32xf32>
    %67 = arith.divf %65, %66 : vector<8x32xf32>
    %68 = vector.extract_strided_slice %55 {offsets = [0, 64], sizes = [8, 32], strides = [1, 1]} : vector<8x128xf32> to vector<8x32xf32>
    %69 = math.tanh %68 : vector<8x32xf32>
    %70 = vector.extract_strided_slice %55 {offsets = [0, 96], sizes = [8, 32], strides = [1, 1]} : vector<8x128xf32> to vector<8x32xf32>
    %71 = arith.negf %70 : vector<8x32xf32>
    %72 = math.exp %71 : vector<8x32xf32>
    %cst_30 = arith.constant 1.000000e+00 : f32
    %73 = vector.broadcast %cst_30 : f32 to vector<8x32xf32>
    %74 = arith.addf %73, %72 : vector<8x32xf32>
    %75 = arith.divf %73, %74 : vector<8x32xf32>
    %76 = arith.mulf %67, %15 : vector<8x32xf32>
    %77 = arith.mulf %61, %69 : vector<8x32xf32>
    %78 = arith.addf %76, %77 : vector<8x32xf32>
    %79 = math.tanh %78 : vector<8x32xf32>
    %80 = arith.mulf %75, %79 : vector<8x32xf32>
    %81 = arith.index_cast %51 : i32 to index
    %c32 = arith.constant 32 : index
    %82 = vector.load %arg16[%81, %c32] : memref<64x64xf32, #tpu.memory_space<vmem>>, vector<8x32xf32>
    tpu.vector_store %arg16[%81, %c32], %80 {strides = array<i32>} : memref<64x64xf32, #tpu.memory_space<vmem>>, vector<8x32xf32>,
    %c1_i32 = arith.constant 1 : i32
    %c8_i32_31 = arith.constant 8 : i32
    %83 = arith.muli %c1_i32, %c8_i32_31 : i32
    %84 = tpu.assume_multiple %83, 8 : i32
    %85 = arith.index_cast %84 : i32 to index
    %c0_32 = arith.constant 0 : index
    %86 = vector.load %arg14[%85, %c0_32] : memref<64x128xf32, #tpu.memory_space<vmem>>, vector<8x128xf32>
    %cst_33 = arith.constant dense<0.000000e+00> : vector<8x128xf32>
    %87 = tpu.matmul %46, %13, %cst_33 {dimension_numbers = #tpu.dot_dimension_numbers<[1], [0], [0], [1], [0, 0, 1, 1], [], []>} : vector<8x32xf32>, vector<32x128xf32>, vector<8x128xf32> -> vector<8x128xf32>
    %88 = arith.addf %86, %87 : vector<8x128xf32>
    %89 = vector.extract_strided_slice %88 {offsets = [0, 0], sizes = [8, 32], strides = [1, 1]} : vector<8x128xf32> to vector<8x32xf32>
    %90 = arith.negf %89 : vector<8x32xf32>
    %91 = math.exp %90 : vector<8x32xf32>
    %cst_34 = arith.constant 1.000000e+00 : f32
    %92 = vector.broadcast %cst_34 : f32 to vector<8x32xf32>
    %93 = arith.addf %92, %91 : vector<8x32xf32>
    %94 = arith.divf %92, %93 : vector<8x32xf32>
    %95 = vector.extract_strided_slice %88 {offsets = [0, 32], sizes = [8, 32], strides = [1, 1]} : vector<8x128xf32> to vector<8x32xf32>
    %96 = arith.negf %95 : vector<8x32xf32>
    %97 = math.exp %96 : vector<8x32xf32>
    %cst_35 = arith.constant 1.000000e+00 : f32
    %98 = vector.broadcast %cst_35 : f32 to vector<8x32xf32>
    %99 = arith.addf %98, %97 : vector<8x32xf32>
    %100 = arith.divf %98, %99 : vector<8x32xf32>
    %101 = vector.extract_strided_slice %88 {offsets = [0, 64], sizes = [8, 32], strides = [1, 1]} : vector<8x128xf32> to vector<8x32xf32>
    %102 = math.tanh %101 : vector<8x32xf32>
    %103 = vector.extract_strided_slice %88 {offsets = [0, 96], sizes = [8, 32], strides = [1, 1]} : vector<8x128xf32> to vector<8x32xf32>
    %104 = arith.negf %103 : vector<8x32xf32>
    %105 = math.exp %104 : vector<8x32xf32>
    %cst_36 = arith.constant 1.000000e+00 : f32
    %106 = vector.broadcast %cst_36 : f32 to vector<8x32xf32>
    %107 = arith.addf %106, %105 : vector<8x32xf32>
    %108 = arith.divf %106, %107 : vector<8x32xf32>
    %109 = arith.mulf %100, %44 : vector<8x32xf32>
    %110 = arith.mulf %94, %102 : vector<8x32xf32>
    %111 = arith.addf %109, %110 : vector<8x32xf32>
    %112 = math.tanh %111 : vector<8x32xf32>
    %113 = arith.mulf %108, %112 : vector<8x32xf32>
    %114 = arith.index_cast %84 : i32 to index
    %c0_37 = arith.constant 0 : index
    %115 = vector.load %arg16[%114, %c0_37] : memref<64x64xf32, #tpu.memory_space<vmem>>, vector<8x32xf32>
    tpu.vector_store %arg16[%114, %c0_37], %113 {strides = array<i32>} : memref<64x64xf32, #tpu.memory_space<vmem>>, vector<8x32xf32>,
    %c7_i32_38 = arith.constant 7 : i32
    %116 = arith.subi %c7_i32_38, %c1_i32 : i32
    %c8_i32_39 = arith.constant 8 : i32
    %117 = arith.muli %116, %c8_i32_39 : i32
    %118 = tpu.assume_multiple %117, 8 : i32
    %119 = arith.index_cast %118 : i32 to index
    %c0_40 = arith.constant 0 : index
    %120 = vector.load %arg15[%119, %c0_40] : memref<64x128xf32, #tpu.memory_space<vmem>>, vector<8x128xf32>
    %cst_41 = arith.constant dense<0.000000e+00> : vector<8x128xf32>
    %121 = tpu.matmul %80, %14, %cst_41 {dimension_numbers = #tpu.dot_dimension_numbers<[1], [0], [0], [1], [0, 0, 1, 1], [], []>} : vector<8x32xf32>, vector<32x128xf32>, vector<8x128xf32> -> vector<8x128xf32>
    %122 = arith.addf %120, %121 : vector<8x128xf32>
    %123 = vector.extract_strided_slice %122 {offsets = [0, 0], sizes = [8, 32], strides = [1, 1]} : vector<8x128xf32> to vector<8x32xf32>
    %124 = arith.negf %123 : vector<8x32xf32>
    %125 = math.exp %124 : vector<8x32xf32>
    %cst_42 = arith.constant 1.000000e+00 : f32
    %126 = vector.broadcast %cst_42 : f32 to vector<8x32xf32>
    %127 = arith.addf %126, %125 : vector<8x32xf32>
    %128 = arith.divf %126, %127 : vector<8x32xf32>
    %129 = vector.extract_strided_slice %122 {offsets = [0, 32], sizes = [8, 32], strides = [1, 1]} : vector<8x128xf32> to vector<8x32xf32>
    %130 = arith.negf %129 : vector<8x32xf32>
    %131 = math.exp %130 : vector<8x32xf32>
    %cst_43 = arith.constant 1.000000e+00 : f32
    %132 = vector.broadcast %cst_43 : f32 to vector<8x32xf32>
    %133 = arith.addf %132, %131 : vector<8x32xf32>
    %134 = arith.divf %132, %133 : vector<8x32xf32>
    %135 = vector.extract_strided_slice %122 {offsets = [0, 64], sizes = [8, 32], strides = [1, 1]} : vector<8x128xf32> to vector<8x32xf32>
    %136 = math.tanh %135 : vector<8x32xf32>
    %137 = vector.extract_strided_slice %122 {offsets = [0, 96], sizes = [8, 32], strides = [1, 1]} : vector<8x128xf32> to vector<8x32xf32>
    %138 = arith.negf %137 : vector<8x32xf32>
    %139 = math.exp %138 : vector<8x32xf32>
    %cst_44 = arith.constant 1.000000e+00 : f32
    %140 = vector.broadcast %cst_44 : f32 to vector<8x32xf32>
    %141 = arith.addf %140, %139 : vector<8x32xf32>
    %142 = arith.divf %140, %141 : vector<8x32xf32>
    %143 = arith.mulf %134, %78 : vector<8x32xf32>
    %144 = arith.mulf %128, %136 : vector<8x32xf32>
    %145 = arith.addf %143, %144 : vector<8x32xf32>
    %146 = math.tanh %145 : vector<8x32xf32>
    %147 = arith.mulf %142, %146 : vector<8x32xf32>
    %148 = arith.index_cast %118 : i32 to index
    %c32_45 = arith.constant 32 : index
    %149 = vector.load %arg16[%148, %c32_45] : memref<64x64xf32, #tpu.memory_space<vmem>>, vector<8x32xf32>
    tpu.vector_store %arg16[%148, %c32_45], %147 {strides = array<i32>} : memref<64x64xf32, #tpu.memory_space<vmem>>, vector<8x32xf32>,
    %c2_i32 = arith.constant 2 : i32
    %c8_i32_46 = arith.constant 8 : i32
    %150 = arith.muli %c2_i32, %c8_i32_46 : i32
    %151 = tpu.assume_multiple %150, 8 : i32
    %152 = arith.index_cast %151 : i32 to index
    %c0_47 = arith.constant 0 : index
    %153 = vector.load %arg14[%152, %c0_47] : memref<64x128xf32, #tpu.memory_space<vmem>>, vector<8x128xf32>
    %cst_48 = arith.constant dense<0.000000e+00> : vector<8x128xf32>
    %154 = tpu.matmul %113, %13, %cst_48 {dimension_numbers = #tpu.dot_dimension_numbers<[1], [0], [0], [1], [0, 0, 1, 1], [], []>} : vector<8x32xf32>, vector<32x128xf32>, vector<8x128xf32> -> vector<8x128xf32>
    %155 = arith.addf %153, %154 : vector<8x128xf32>
    %156 = vector.extract_strided_slice %155 {offsets = [0, 0], sizes = [8, 32], strides = [1, 1]} : vector<8x128xf32> to vector<8x32xf32>
    %157 = arith.negf %156 : vector<8x32xf32>
    %158 = math.exp %157 : vector<8x32xf32>
    %cst_49 = arith.constant 1.000000e+00 : f32
    %159 = vector.broadcast %cst_49 : f32 to vector<8x32xf32>
    %160 = arith.addf %159, %158 : vector<8x32xf32>
    %161 = arith.divf %159, %160 : vector<8x32xf32>
    %162 = vector.extract_strided_slice %155 {offsets = [0, 32], sizes = [8, 32], strides = [1, 1]} : vector<8x128xf32> to vector<8x32xf32>
    %163 = arith.negf %162 : vector<8x32xf32>
    %164 = math.exp %163 : vector<8x32xf32>
    %cst_50 = arith.constant 1.000000e+00 : f32
    %165 = vector.broadcast %cst_50 : f32 to vector<8x32xf32>
    %166 = arith.addf %165, %164 : vector<8x32xf32>
    %167 = arith.divf %165, %166 : vector<8x32xf32>
    %168 = vector.extract_strided_slice %155 {offsets = [0, 64], sizes = [8, 32], strides = [1, 1]} : vector<8x128xf32> to vector<8x32xf32>
    %169 = math.tanh %168 : vector<8x32xf32>
    %170 = vector.extract_strided_slice %155 {offsets = [0, 96], sizes = [8, 32], strides = [1, 1]} : vector<8x128xf32> to vector<8x32xf32>
    %171 = arith.negf %170 : vector<8x32xf32>
    %172 = math.exp %171 : vector<8x32xf32>
    %cst_51 = arith.constant 1.000000e+00 : f32
    %173 = vector.broadcast %cst_51 : f32 to vector<8x32xf32>
    %174 = arith.addf %173, %172 : vector<8x32xf32>
    %175 = arith.divf %173, %174 : vector<8x32xf32>
    %176 = arith.mulf %167, %111 : vector<8x32xf32>
    %177 = arith.mulf %161, %169 : vector<8x32xf32>
    %178 = arith.addf %176, %177 : vector<8x32xf32>
    %179 = math.tanh %178 : vector<8x32xf32>
    %180 = arith.mulf %175, %179 : vector<8x32xf32>
    %181 = arith.index_cast %151 : i32 to index
    %c0_52 = arith.constant 0 : index
    %182 = vector.load %arg16[%181, %c0_52] : memref<64x64xf32, #tpu.memory_space<vmem>>, vector<8x32xf32>
    tpu.vector_store %arg16[%181, %c0_52], %180 {strides = array<i32>} : memref<64x64xf32, #tpu.memory_space<vmem>>, vector<8x32xf32>,
    %c7_i32_53 = arith.constant 7 : i32
    %183 = arith.subi %c7_i32_53, %c2_i32 : i32
    %c8_i32_54 = arith.constant 8 : i32
    %184 = arith.muli %183, %c8_i32_54 : i32
    %185 = tpu.assume_multiple %184, 8 : i32
    %186 = arith.index_cast %185 : i32 to index
    %c0_55 = arith.constant 0 : index
    %187 = vector.load %arg15[%186, %c0_55] : memref<64x128xf32, #tpu.memory_space<vmem>>, vector<8x128xf32>
    %cst_56 = arith.constant dense<0.000000e+00> : vector<8x128xf32>
    %188 = tpu.matmul %147, %14, %cst_56 {dimension_numbers = #tpu.dot_dimension_numbers<[1], [0], [0], [1], [0, 0, 1, 1], [], []>} : vector<8x32xf32>, vector<32x128xf32>, vector<8x128xf32> -> vector<8x128xf32>
    %189 = arith.addf %187, %188 : vector<8x128xf32>
    %190 = vector.extract_strided_slice %189 {offsets = [0, 0], sizes = [8, 32], strides = [1, 1]} : vector<8x128xf32> to vector<8x32xf32>
    %191 = arith.negf %190 : vector<8x32xf32>
    %192 = math.exp %191 : vector<8x32xf32>
    %cst_57 = arith.constant 1.000000e+00 : f32
    %193 = vector.broadcast %cst_57 : f32 to vector<8x32xf32>
    %194 = arith.addf %193, %192 : vector<8x32xf32>
    %195 = arith.divf %193, %194 : vector<8x32xf32>
    %196 = vector.extract_strided_slice %189 {offsets = [0, 32], sizes = [8, 32], strides = [1, 1]} : vector<8x128xf32> to vector<8x32xf32>
    %197 = arith.negf %196 : vector<8x32xf32>
    %198 = math.exp %197 : vector<8x32xf32>
    %cst_58 = arith.constant 1.000000e+00 : f32
    %199 = vector.broadcast %cst_58 : f32 to vector<8x32xf32>
    %200 = arith.addf %199, %198 : vector<8x32xf32>
    %201 = arith.divf %199, %200 : vector<8x32xf32>
    %202 = vector.extract_strided_slice %189 {offsets = [0, 64], sizes = [8, 32], strides = [1, 1]} : vector<8x128xf32> to vector<8x32xf32>
    %203 = math.tanh %202 : vector<8x32xf32>
    %204 = vector.extract_strided_slice %189 {offsets = [0, 96], sizes = [8, 32], strides = [1, 1]} : vector<8x128xf32> to vector<8x32xf32>
    %205 = arith.negf %204 : vector<8x32xf32>
    %206 = math.exp %205 : vector<8x32xf32>
    %cst_59 = arith.constant 1.000000e+00 : f32
    %207 = vector.broadcast %cst_59 : f32 to vector<8x32xf32>
    %208 = arith.addf %207, %206 : vector<8x32xf32>
    %209 = arith.divf %207, %208 : vector<8x32xf32>
    %210 = arith.mulf %201, %145 : vector<8x32xf32>
    %211 = arith.mulf %195, %203 : vector<8x32xf32>
    %212 = arith.addf %210, %211 : vector<8x32xf32>
    %213 = math.tanh %212 : vector<8x32xf32>
    %214 = arith.mulf %209, %213 : vector<8x32xf32>
    %215 = arith.index_cast %185 : i32 to index
    %c32_60 = arith.constant 32 : index
    %216 = vector.load %arg16[%215, %c32_60] : memref<64x64xf32, #tpu.memory_space<vmem>>, vector<8x32xf32>
    tpu.vector_store %arg16[%215, %c32_60], %214 {strides = array<i32>} : memref<64x64xf32, #tpu.memory_space<vmem>>, vector<8x32xf32>,
    %c3_i32 = arith.constant 3 : i32
    %c8_i32_61 = arith.constant 8 : i32
    %217 = arith.muli %c3_i32, %c8_i32_61 : i32
    %218 = tpu.assume_multiple %217, 8 : i32
    %219 = arith.index_cast %218 : i32 to index
    %c0_62 = arith.constant 0 : index
    %220 = vector.load %arg14[%219, %c0_62] : memref<64x128xf32, #tpu.memory_space<vmem>>, vector<8x128xf32>
    %cst_63 = arith.constant dense<0.000000e+00> : vector<8x128xf32>
    %221 = tpu.matmul %180, %13, %cst_63 {dimension_numbers = #tpu.dot_dimension_numbers<[1], [0], [0], [1], [0, 0, 1, 1], [], []>} : vector<8x32xf32>, vector<32x128xf32>, vector<8x128xf32> -> vector<8x128xf32>
    %222 = arith.addf %220, %221 : vector<8x128xf32>
    %223 = vector.extract_strided_slice %222 {offsets = [0, 0], sizes = [8, 32], strides = [1, 1]} : vector<8x128xf32> to vector<8x32xf32>
    %224 = arith.negf %223 : vector<8x32xf32>
    %225 = math.exp %224 : vector<8x32xf32>
    %cst_64 = arith.constant 1.000000e+00 : f32
    %226 = vector.broadcast %cst_64 : f32 to vector<8x32xf32>
    %227 = arith.addf %226, %225 : vector<8x32xf32>
    %228 = arith.divf %226, %227 : vector<8x32xf32>
    %229 = vector.extract_strided_slice %222 {offsets = [0, 32], sizes = [8, 32], strides = [1, 1]} : vector<8x128xf32> to vector<8x32xf32>
    %230 = arith.negf %229 : vector<8x32xf32>
    %231 = math.exp %230 : vector<8x32xf32>
    %cst_65 = arith.constant 1.000000e+00 : f32
    %232 = vector.broadcast %cst_65 : f32 to vector<8x32xf32>
    %233 = arith.addf %232, %231 : vector<8x32xf32>
    %234 = arith.divf %232, %233 : vector<8x32xf32>
    %235 = vector.extract_strided_slice %222 {offsets = [0, 64], sizes = [8, 32], strides = [1, 1]} : vector<8x128xf32> to vector<8x32xf32>
    %236 = math.tanh %235 : vector<8x32xf32>
    %237 = vector.extract_strided_slice %222 {offsets = [0, 96], sizes = [8, 32], strides = [1, 1]} : vector<8x128xf32> to vector<8x32xf32>
    %238 = arith.negf %237 : vector<8x32xf32>
    %239 = math.exp %238 : vector<8x32xf32>
    %cst_66 = arith.constant 1.000000e+00 : f32
    %240 = vector.broadcast %cst_66 : f32 to vector<8x32xf32>
    %241 = arith.addf %240, %239 : vector<8x32xf32>
    %242 = arith.divf %240, %241 : vector<8x32xf32>
    %243 = arith.mulf %234, %178 : vector<8x32xf32>
    %244 = arith.mulf %228, %236 : vector<8x32xf32>
    %245 = arith.addf %243, %244 : vector<8x32xf32>
    %246 = math.tanh %245 : vector<8x32xf32>
    %247 = arith.mulf %242, %246 : vector<8x32xf32>
    %248 = arith.index_cast %218 : i32 to index
    %c0_67 = arith.constant 0 : index
    %249 = vector.load %arg16[%248, %c0_67] : memref<64x64xf32, #tpu.memory_space<vmem>>, vector<8x32xf32>
    tpu.vector_store %arg16[%248, %c0_67], %247 {strides = array<i32>} : memref<64x64xf32, #tpu.memory_space<vmem>>, vector<8x32xf32>,
    %c7_i32_68 = arith.constant 7 : i32
    %250 = arith.subi %c7_i32_68, %c3_i32 : i32
    %c8_i32_69 = arith.constant 8 : i32
    %251 = arith.muli %250, %c8_i32_69 : i32
    %252 = tpu.assume_multiple %251, 8 : i32
    %253 = arith.index_cast %252 : i32 to index
    %c0_70 = arith.constant 0 : index
    %254 = vector.load %arg15[%253, %c0_70] : memref<64x128xf32, #tpu.memory_space<vmem>>, vector<8x128xf32>
    %cst_71 = arith.constant dense<0.000000e+00> : vector<8x128xf32>
    %255 = tpu.matmul %214, %14, %cst_71 {dimension_numbers = #tpu.dot_dimension_numbers<[1], [0], [0], [1], [0, 0, 1, 1], [], []>} : vector<8x32xf32>, vector<32x128xf32>, vector<8x128xf32> -> vector<8x128xf32>
    %256 = arith.addf %254, %255 : vector<8x128xf32>
    %257 = vector.extract_strided_slice %256 {offsets = [0, 0], sizes = [8, 32], strides = [1, 1]} : vector<8x128xf32> to vector<8x32xf32>
    %258 = arith.negf %257 : vector<8x32xf32>
    %259 = math.exp %258 : vector<8x32xf32>
    %cst_72 = arith.constant 1.000000e+00 : f32
    %260 = vector.broadcast %cst_72 : f32 to vector<8x32xf32>
    %261 = arith.addf %260, %259 : vector<8x32xf32>
    %262 = arith.divf %260, %261 : vector<8x32xf32>
    %263 = vector.extract_strided_slice %256 {offsets = [0, 32], sizes = [8, 32], strides = [1, 1]} : vector<8x128xf32> to vector<8x32xf32>
    %264 = arith.negf %263 : vector<8x32xf32>
    %265 = math.exp %264 : vector<8x32xf32>
    %cst_73 = arith.constant 1.000000e+00 : f32
    %266 = vector.broadcast %cst_73 : f32 to vector<8x32xf32>
    %267 = arith.addf %266, %265 : vector<8x32xf32>
    %268 = arith.divf %266, %267 : vector<8x32xf32>
    %269 = vector.extract_strided_slice %256 {offsets = [0, 64], sizes = [8, 32], strides = [1, 1]} : vector<8x128xf32> to vector<8x32xf32>
    %270 = math.tanh %269 : vector<8x32xf32>
    %271 = vector.extract_strided_slice %256 {offsets = [0, 96], sizes = [8, 32], strides = [1, 1]} : vector<8x128xf32> to vector<8x32xf32>
    %272 = arith.negf %271 : vector<8x32xf32>
    %273 = math.exp %272 : vector<8x32xf32>
    %cst_74 = arith.constant 1.000000e+00 : f32
    %274 = vector.broadcast %cst_74 : f32 to vector<8x32xf32>
    %275 = arith.addf %274, %273 : vector<8x32xf32>
    %276 = arith.divf %274, %275 : vector<8x32xf32>
    %277 = arith.mulf %268, %212 : vector<8x32xf32>
    %278 = arith.mulf %262, %270 : vector<8x32xf32>
    %279 = arith.addf %277, %278 : vector<8x32xf32>
    %280 = math.tanh %279 : vector<8x32xf32>
    %281 = arith.mulf %276, %280 : vector<8x32xf32>
    %282 = arith.index_cast %252 : i32 to index
    %c32_75 = arith.constant 32 : index
    %283 = vector.load %arg16[%282, %c32_75] : memref<64x64xf32, #tpu.memory_space<vmem>>, vector<8x32xf32>
    tpu.vector_store %arg16[%282, %c32_75], %281 {strides = array<i32>} : memref<64x64xf32, #tpu.memory_space<vmem>>, vector<8x32xf32>,
    %c4_i32 = arith.constant 4 : i32
    %c8_i32_76 = arith.constant 8 : i32
    %284 = arith.muli %c4_i32, %c8_i32_76 : i32
    %285 = tpu.assume_multiple %284, 8 : i32
    %286 = arith.index_cast %285 : i32 to index
    %c0_77 = arith.constant 0 : index
    %287 = vector.load %arg14[%286, %c0_77] : memref<64x128xf32, #tpu.memory_space<vmem>>, vector<8x128xf32>
    %cst_78 = arith.constant dense<0.000000e+00> : vector<8x128xf32>
    %288 = tpu.matmul %247, %13, %cst_78 {dimension_numbers = #tpu.dot_dimension_numbers<[1], [0], [0], [1], [0, 0, 1, 1], [], []>} : vector<8x32xf32>, vector<32x128xf32>, vector<8x128xf32> -> vector<8x128xf32>
    %289 = arith.addf %287, %288 : vector<8x128xf32>
    %290 = vector.extract_strided_slice %289 {offsets = [0, 0], sizes = [8, 32], strides = [1, 1]} : vector<8x128xf32> to vector<8x32xf32>
    %291 = arith.negf %290 : vector<8x32xf32>
    %292 = math.exp %291 : vector<8x32xf32>
    %cst_79 = arith.constant 1.000000e+00 : f32
    %293 = vector.broadcast %cst_79 : f32 to vector<8x32xf32>
    %294 = arith.addf %293, %292 : vector<8x32xf32>
    %295 = arith.divf %293, %294 : vector<8x32xf32>
    %296 = vector.extract_strided_slice %289 {offsets = [0, 32], sizes = [8, 32], strides = [1, 1]} : vector<8x128xf32> to vector<8x32xf32>
    %297 = arith.negf %296 : vector<8x32xf32>
    %298 = math.exp %297 : vector<8x32xf32>
    %cst_80 = arith.constant 1.000000e+00 : f32
    %299 = vector.broadcast %cst_80 : f32 to vector<8x32xf32>
    %300 = arith.addf %299, %298 : vector<8x32xf32>
    %301 = arith.divf %299, %300 : vector<8x32xf32>
    %302 = vector.extract_strided_slice %289 {offsets = [0, 64], sizes = [8, 32], strides = [1, 1]} : vector<8x128xf32> to vector<8x32xf32>
    %303 = math.tanh %302 : vector<8x32xf32>
    %304 = vector.extract_strided_slice %289 {offsets = [0, 96], sizes = [8, 32], strides = [1, 1]} : vector<8x128xf32> to vector<8x32xf32>
    %305 = arith.negf %304 : vector<8x32xf32>
    %306 = math.exp %305 : vector<8x32xf32>
    %cst_81 = arith.constant 1.000000e+00 : f32
    %307 = vector.broadcast %cst_81 : f32 to vector<8x32xf32>
    %308 = arith.addf %307, %306 : vector<8x32xf32>
    %309 = arith.divf %307, %308 : vector<8x32xf32>
    %310 = arith.mulf %301, %245 : vector<8x32xf32>
    %311 = arith.mulf %295, %303 : vector<8x32xf32>
    %312 = arith.addf %310, %311 : vector<8x32xf32>
    %313 = math.tanh %312 : vector<8x32xf32>
    %314 = arith.mulf %309, %313 : vector<8x32xf32>
    %315 = arith.index_cast %285 : i32 to index
    %c0_82 = arith.constant 0 : index
    %316 = vector.load %arg16[%315, %c0_82] : memref<64x64xf32, #tpu.memory_space<vmem>>, vector<8x32xf32>
    tpu.vector_store %arg16[%315, %c0_82], %314 {strides = array<i32>} : memref<64x64xf32, #tpu.memory_space<vmem>>, vector<8x32xf32>,
    %c7_i32_83 = arith.constant 7 : i32
    %317 = arith.subi %c7_i32_83, %c4_i32 : i32
    %c8_i32_84 = arith.constant 8 : i32
    %318 = arith.muli %317, %c8_i32_84 : i32
    %319 = tpu.assume_multiple %318, 8 : i32
    %320 = arith.index_cast %319 : i32 to index
    %c0_85 = arith.constant 0 : index
    %321 = vector.load %arg15[%320, %c0_85] : memref<64x128xf32, #tpu.memory_space<vmem>>, vector<8x128xf32>
    %cst_86 = arith.constant dense<0.000000e+00> : vector<8x128xf32>
    %322 = tpu.matmul %281, %14, %cst_86 {dimension_numbers = #tpu.dot_dimension_numbers<[1], [0], [0], [1], [0, 0, 1, 1], [], []>} : vector<8x32xf32>, vector<32x128xf32>, vector<8x128xf32> -> vector<8x128xf32>
    %323 = arith.addf %321, %322 : vector<8x128xf32>
    %324 = vector.extract_strided_slice %323 {offsets = [0, 0], sizes = [8, 32], strides = [1, 1]} : vector<8x128xf32> to vector<8x32xf32>
    %325 = arith.negf %324 : vector<8x32xf32>
    %326 = math.exp %325 : vector<8x32xf32>
    %cst_87 = arith.constant 1.000000e+00 : f32
    %327 = vector.broadcast %cst_87 : f32 to vector<8x32xf32>
    %328 = arith.addf %327, %326 : vector<8x32xf32>
    %329 = arith.divf %327, %328 : vector<8x32xf32>
    %330 = vector.extract_strided_slice %323 {offsets = [0, 32], sizes = [8, 32], strides = [1, 1]} : vector<8x128xf32> to vector<8x32xf32>
    %331 = arith.negf %330 : vector<8x32xf32>
    %332 = math.exp %331 : vector<8x32xf32>
    %cst_88 = arith.constant 1.000000e+00 : f32
    %333 = vector.broadcast %cst_88 : f32 to vector<8x32xf32>
    %334 = arith.addf %333, %332 : vector<8x32xf32>
    %335 = arith.divf %333, %334 : vector<8x32xf32>
    %336 = vector.extract_strided_slice %323 {offsets = [0, 64], sizes = [8, 32], strides = [1, 1]} : vector<8x128xf32> to vector<8x32xf32>
    %337 = math.tanh %336 : vector<8x32xf32>
    %338 = vector.extract_strided_slice %323 {offsets = [0, 96], sizes = [8, 32], strides = [1, 1]} : vector<8x128xf32> to vector<8x32xf32>
    %339 = arith.negf %338 : vector<8x32xf32>
    %340 = math.exp %339 : vector<8x32xf32>
    %cst_89 = arith.constant 1.000000e+00 : f32
    %341 = vector.broadcast %cst_89 : f32 to vector<8x32xf32>
    %342 = arith.addf %341, %340 : vector<8x32xf32>
    %343 = arith.divf %341, %342 : vector<8x32xf32>
    %344 = arith.mulf %335, %279 : vector<8x32xf32>
    %345 = arith.mulf %329, %337 : vector<8x32xf32>
    %346 = arith.addf %344, %345 : vector<8x32xf32>
    %347 = math.tanh %346 : vector<8x32xf32>
    %348 = arith.mulf %343, %347 : vector<8x32xf32>
    %349 = arith.index_cast %319 : i32 to index
    %c32_90 = arith.constant 32 : index
    %350 = vector.load %arg16[%349, %c32_90] : memref<64x64xf32, #tpu.memory_space<vmem>>, vector<8x32xf32>
    tpu.vector_store %arg16[%349, %c32_90], %348 {strides = array<i32>} : memref<64x64xf32, #tpu.memory_space<vmem>>, vector<8x32xf32>,
    %c5_i32 = arith.constant 5 : i32
    %c8_i32_91 = arith.constant 8 : i32
    %351 = arith.muli %c5_i32, %c8_i32_91 : i32
    %352 = tpu.assume_multiple %351, 8 : i32
    %353 = arith.index_cast %352 : i32 to index
    %c0_92 = arith.constant 0 : index
    %354 = vector.load %arg14[%353, %c0_92] : memref<64x128xf32, #tpu.memory_space<vmem>>, vector<8x128xf32>
    %cst_93 = arith.constant dense<0.000000e+00> : vector<8x128xf32>
    %355 = tpu.matmul %314, %13, %cst_93 {dimension_numbers = #tpu.dot_dimension_numbers<[1], [0], [0], [1], [0, 0, 1, 1], [], []>} : vector<8x32xf32>, vector<32x128xf32>, vector<8x128xf32> -> vector<8x128xf32>
    %356 = arith.addf %354, %355 : vector<8x128xf32>
    %357 = vector.extract_strided_slice %356 {offsets = [0, 0], sizes = [8, 32], strides = [1, 1]} : vector<8x128xf32> to vector<8x32xf32>
    %358 = arith.negf %357 : vector<8x32xf32>
    %359 = math.exp %358 : vector<8x32xf32>
    %cst_94 = arith.constant 1.000000e+00 : f32
    %360 = vector.broadcast %cst_94 : f32 to vector<8x32xf32>
    %361 = arith.addf %360, %359 : vector<8x32xf32>
    %362 = arith.divf %360, %361 : vector<8x32xf32>
    %363 = vector.extract_strided_slice %356 {offsets = [0, 32], sizes = [8, 32], strides = [1, 1]} : vector<8x128xf32> to vector<8x32xf32>
    %364 = arith.negf %363 : vector<8x32xf32>
    %365 = math.exp %364 : vector<8x32xf32>
    %cst_95 = arith.constant 1.000000e+00 : f32
    %366 = vector.broadcast %cst_95 : f32 to vector<8x32xf32>
    %367 = arith.addf %366, %365 : vector<8x32xf32>
    %368 = arith.divf %366, %367 : vector<8x32xf32>
    %369 = vector.extract_strided_slice %356 {offsets = [0, 64], sizes = [8, 32], strides = [1, 1]} : vector<8x128xf32> to vector<8x32xf32>
    %370 = math.tanh %369 : vector<8x32xf32>
    %371 = vector.extract_strided_slice %356 {offsets = [0, 96], sizes = [8, 32], strides = [1, 1]} : vector<8x128xf32> to vector<8x32xf32>
    %372 = arith.negf %371 : vector<8x32xf32>
    %373 = math.exp %372 : vector<8x32xf32>
    %cst_96 = arith.constant 1.000000e+00 : f32
    %374 = vector.broadcast %cst_96 : f32 to vector<8x32xf32>
    %375 = arith.addf %374, %373 : vector<8x32xf32>
    %376 = arith.divf %374, %375 : vector<8x32xf32>
    %377 = arith.mulf %368, %312 : vector<8x32xf32>
    %378 = arith.mulf %362, %370 : vector<8x32xf32>
    %379 = arith.addf %377, %378 : vector<8x32xf32>
    %380 = math.tanh %379 : vector<8x32xf32>
    %381 = arith.mulf %376, %380 : vector<8x32xf32>
    %382 = arith.index_cast %352 : i32 to index
    %c0_97 = arith.constant 0 : index
    %383 = vector.load %arg16[%382, %c0_97] : memref<64x64xf32, #tpu.memory_space<vmem>>, vector<8x32xf32>
    tpu.vector_store %arg16[%382, %c0_97], %381 {strides = array<i32>} : memref<64x64xf32, #tpu.memory_space<vmem>>, vector<8x32xf32>,
    %c7_i32_98 = arith.constant 7 : i32
    %384 = arith.subi %c7_i32_98, %c5_i32 : i32
    %c8_i32_99 = arith.constant 8 : i32
    %385 = arith.muli %384, %c8_i32_99 : i32
    %386 = tpu.assume_multiple %385, 8 : i32
    %387 = arith.index_cast %386 : i32 to index
    %c0_100 = arith.constant 0 : index
    %388 = vector.load %arg15[%387, %c0_100] : memref<64x128xf32, #tpu.memory_space<vmem>>, vector<8x128xf32>
    %cst_101 = arith.constant dense<0.000000e+00> : vector<8x128xf32>
    %389 = tpu.matmul %348, %14, %cst_101 {dimension_numbers = #tpu.dot_dimension_numbers<[1], [0], [0], [1], [0, 0, 1, 1], [], []>} : vector<8x32xf32>, vector<32x128xf32>, vector<8x128xf32> -> vector<8x128xf32>
    %390 = arith.addf %388, %389 : vector<8x128xf32>
    %391 = vector.extract_strided_slice %390 {offsets = [0, 0], sizes = [8, 32], strides = [1, 1]} : vector<8x128xf32> to vector<8x32xf32>
    %392 = arith.negf %391 : vector<8x32xf32>
    %393 = math.exp %392 : vector<8x32xf32>
    %cst_102 = arith.constant 1.000000e+00 : f32
    %394 = vector.broadcast %cst_102 : f32 to vector<8x32xf32>
    %395 = arith.addf %394, %393 : vector<8x32xf32>
    %396 = arith.divf %394, %395 : vector<8x32xf32>
    %397 = vector.extract_strided_slice %390 {offsets = [0, 32], sizes = [8, 32], strides = [1, 1]} : vector<8x128xf32> to vector<8x32xf32>
    %398 = arith.negf %397 : vector<8x32xf32>
    %399 = math.exp %398 : vector<8x32xf32>
    %cst_103 = arith.constant 1.000000e+00 : f32
    %400 = vector.broadcast %cst_103 : f32 to vector<8x32xf32>
    %401 = arith.addf %400, %399 : vector<8x32xf32>
    %402 = arith.divf %400, %401 : vector<8x32xf32>
    %403 = vector.extract_strided_slice %390 {offsets = [0, 64], sizes = [8, 32], strides = [1, 1]} : vector<8x128xf32> to vector<8x32xf32>
    %404 = math.tanh %403 : vector<8x32xf32>
    %405 = vector.extract_strided_slice %390 {offsets = [0, 96], sizes = [8, 32], strides = [1, 1]} : vector<8x128xf32> to vector<8x32xf32>
    %406 = arith.negf %405 : vector<8x32xf32>
    %407 = math.exp %406 : vector<8x32xf32>
    %cst_104 = arith.constant 1.000000e+00 : f32
    %408 = vector.broadcast %cst_104 : f32 to vector<8x32xf32>
    %409 = arith.addf %408, %407 : vector<8x32xf32>
    %410 = arith.divf %408, %409 : vector<8x32xf32>
    %411 = arith.mulf %402, %346 : vector<8x32xf32>
    %412 = arith.mulf %396, %404 : vector<8x32xf32>
    %413 = arith.addf %411, %412 : vector<8x32xf32>
    %414 = math.tanh %413 : vector<8x32xf32>
    %415 = arith.mulf %410, %414 : vector<8x32xf32>
    %416 = arith.index_cast %386 : i32 to index
    %c32_105 = arith.constant 32 : index
    %417 = vector.load %arg16[%416, %c32_105] : memref<64x64xf32, #tpu.memory_space<vmem>>, vector<8x32xf32>
    tpu.vector_store %arg16[%416, %c32_105], %415 {strides = array<i32>} : memref<64x64xf32, #tpu.memory_space<vmem>>, vector<8x32xf32>,
    %c6_i32 = arith.constant 6 : i32
    %c8_i32_106 = arith.constant 8 : i32
    %418 = arith.muli %c6_i32, %c8_i32_106 : i32
    %419 = tpu.assume_multiple %418, 8 : i32
    %420 = arith.index_cast %419 : i32 to index
    %c0_107 = arith.constant 0 : index
    %421 = vector.load %arg14[%420, %c0_107] : memref<64x128xf32, #tpu.memory_space<vmem>>, vector<8x128xf32>
    %cst_108 = arith.constant dense<0.000000e+00> : vector<8x128xf32>
    %422 = tpu.matmul %381, %13, %cst_108 {dimension_numbers = #tpu.dot_dimension_numbers<[1], [0], [0], [1], [0, 0, 1, 1], [], []>} : vector<8x32xf32>, vector<32x128xf32>, vector<8x128xf32> -> vector<8x128xf32>
    %423 = arith.addf %421, %422 : vector<8x128xf32>
    %424 = vector.extract_strided_slice %423 {offsets = [0, 0], sizes = [8, 32], strides = [1, 1]} : vector<8x128xf32> to vector<8x32xf32>
    %425 = arith.negf %424 : vector<8x32xf32>
    %426 = math.exp %425 : vector<8x32xf32>
    %cst_109 = arith.constant 1.000000e+00 : f32
    %427 = vector.broadcast %cst_109 : f32 to vector<8x32xf32>
    %428 = arith.addf %427, %426 : vector<8x32xf32>
    %429 = arith.divf %427, %428 : vector<8x32xf32>
    %430 = vector.extract_strided_slice %423 {offsets = [0, 32], sizes = [8, 32], strides = [1, 1]} : vector<8x128xf32> to vector<8x32xf32>
    %431 = arith.negf %430 : vector<8x32xf32>
    %432 = math.exp %431 : vector<8x32xf32>
    %cst_110 = arith.constant 1.000000e+00 : f32
    %433 = vector.broadcast %cst_110 : f32 to vector<8x32xf32>
    %434 = arith.addf %433, %432 : vector<8x32xf32>
    %435 = arith.divf %433, %434 : vector<8x32xf32>
    %436 = vector.extract_strided_slice %423 {offsets = [0, 64], sizes = [8, 32], strides = [1, 1]} : vector<8x128xf32> to vector<8x32xf32>
    %437 = math.tanh %436 : vector<8x32xf32>
    %438 = vector.extract_strided_slice %423 {offsets = [0, 96], sizes = [8, 32], strides = [1, 1]} : vector<8x128xf32> to vector<8x32xf32>
    %439 = arith.negf %438 : vector<8x32xf32>
    %440 = math.exp %439 : vector<8x32xf32>
    %cst_111 = arith.constant 1.000000e+00 : f32
    %441 = vector.broadcast %cst_111 : f32 to vector<8x32xf32>
    %442 = arith.addf %441, %440 : vector<8x32xf32>
    %443 = arith.divf %441, %442 : vector<8x32xf32>
    %444 = arith.mulf %435, %379 : vector<8x32xf32>
    %445 = arith.mulf %429, %437 : vector<8x32xf32>
    %446 = arith.addf %444, %445 : vector<8x32xf32>
    %447 = math.tanh %446 : vector<8x32xf32>
    %448 = arith.mulf %443, %447 : vector<8x32xf32>
    %449 = arith.index_cast %419 : i32 to index
    %c0_112 = arith.constant 0 : index
    %450 = vector.load %arg16[%449, %c0_112] : memref<64x64xf32, #tpu.memory_space<vmem>>, vector<8x32xf32>
    tpu.vector_store %arg16[%449, %c0_112], %448 {strides = array<i32>} : memref<64x64xf32, #tpu.memory_space<vmem>>, vector<8x32xf32>,
    %c7_i32_113 = arith.constant 7 : i32
    %451 = arith.subi %c7_i32_113, %c6_i32 : i32
    %c8_i32_114 = arith.constant 8 : i32
    %452 = arith.muli %451, %c8_i32_114 : i32
    %453 = tpu.assume_multiple %452, 8 : i32
    %454 = arith.index_cast %453 : i32 to index
    %c0_115 = arith.constant 0 : index
    %455 = vector.load %arg15[%454, %c0_115] : memref<64x128xf32, #tpu.memory_space<vmem>>, vector<8x128xf32>
    %cst_116 = arith.constant dense<0.000000e+00> : vector<8x128xf32>
    %456 = tpu.matmul %415, %14, %cst_116 {dimension_numbers = #tpu.dot_dimension_numbers<[1], [0], [0], [1], [0, 0, 1, 1], [], []>} : vector<8x32xf32>, vector<32x128xf32>, vector<8x128xf32> -> vector<8x128xf32>
    %457 = arith.addf %455, %456 : vector<8x128xf32>
    %458 = vector.extract_strided_slice %457 {offsets = [0, 0], sizes = [8, 32], strides = [1, 1]} : vector<8x128xf32> to vector<8x32xf32>
    %459 = arith.negf %458 : vector<8x32xf32>
    %460 = math.exp %459 : vector<8x32xf32>
    %cst_117 = arith.constant 1.000000e+00 : f32
    %461 = vector.broadcast %cst_117 : f32 to vector<8x32xf32>
    %462 = arith.addf %461, %460 : vector<8x32xf32>
    %463 = arith.divf %461, %462 : vector<8x32xf32>
    %464 = vector.extract_strided_slice %457 {offsets = [0, 32], sizes = [8, 32], strides = [1, 1]} : vector<8x128xf32> to vector<8x32xf32>
    %465 = arith.negf %464 : vector<8x32xf32>
    %466 = math.exp %465 : vector<8x32xf32>
    %cst_118 = arith.constant 1.000000e+00 : f32
    %467 = vector.broadcast %cst_118 : f32 to vector<8x32xf32>
    %468 = arith.addf %467, %466 : vector<8x32xf32>
    %469 = arith.divf %467, %468 : vector<8x32xf32>
    %470 = vector.extract_strided_slice %457 {offsets = [0, 64], sizes = [8, 32], strides = [1, 1]} : vector<8x128xf32> to vector<8x32xf32>
    %471 = math.tanh %470 : vector<8x32xf32>
    %472 = vector.extract_strided_slice %457 {offsets = [0, 96], sizes = [8, 32], strides = [1, 1]} : vector<8x128xf32> to vector<8x32xf32>
    %473 = arith.negf %472 : vector<8x32xf32>
    %474 = math.exp %473 : vector<8x32xf32>
    %cst_119 = arith.constant 1.000000e+00 : f32
    %475 = vector.broadcast %cst_119 : f32 to vector<8x32xf32>
    %476 = arith.addf %475, %474 : vector<8x32xf32>
    %477 = arith.divf %475, %476 : vector<8x32xf32>
    %478 = arith.mulf %469, %413 : vector<8x32xf32>
    %479 = arith.mulf %463, %471 : vector<8x32xf32>
    %480 = arith.addf %478, %479 : vector<8x32xf32>
    %481 = math.tanh %480 : vector<8x32xf32>
    %482 = arith.mulf %477, %481 : vector<8x32xf32>
    %483 = arith.index_cast %453 : i32 to index
    %c32_120 = arith.constant 32 : index
    %484 = vector.load %arg16[%483, %c32_120] : memref<64x64xf32, #tpu.memory_space<vmem>>, vector<8x32xf32>
    tpu.vector_store %arg16[%483, %c32_120], %482 {strides = array<i32>} : memref<64x64xf32, #tpu.memory_space<vmem>>, vector<8x32xf32>,
    %c7_i32_121 = arith.constant 7 : i32
    %c8_i32_122 = arith.constant 8 : i32
    %485 = arith.muli %c7_i32_121, %c8_i32_122 : i32
    %486 = tpu.assume_multiple %485, 8 : i32
    %487 = arith.index_cast %486 : i32 to index
    %c0_123 = arith.constant 0 : index
    %488 = vector.load %arg14[%487, %c0_123] : memref<64x128xf32, #tpu.memory_space<vmem>>, vector<8x128xf32>
    %cst_124 = arith.constant dense<0.000000e+00> : vector<8x128xf32>
    %489 = tpu.matmul %448, %13, %cst_124 {dimension_numbers = #tpu.dot_dimension_numbers<[1], [0], [0], [1], [0, 0, 1, 1], [], []>} : vector<8x32xf32>, vector<32x128xf32>, vector<8x128xf32> -> vector<8x128xf32>
    %490 = arith.addf %488, %489 : vector<8x128xf32>
    %491 = vector.extract_strided_slice %490 {offsets = [0, 0], sizes = [8, 32], strides = [1, 1]} : vector<8x128xf32> to vector<8x32xf32>
    %492 = arith.negf %491 : vector<8x32xf32>
    %493 = math.exp %492 : vector<8x32xf32>
    %cst_125 = arith.constant 1.000000e+00 : f32
    %494 = vector.broadcast %cst_125 : f32 to vector<8x32xf32>
    %495 = arith.addf %494, %493 : vector<8x32xf32>
    %496 = arith.divf %494, %495 : vector<8x32xf32>
    %497 = vector.extract_strided_slice %490 {offsets = [0, 32], sizes = [8, 32], strides = [1, 1]} : vector<8x128xf32> to vector<8x32xf32>
    %498 = arith.negf %497 : vector<8x32xf32>
    %499 = math.exp %498 : vector<8x32xf32>
    %cst_126 = arith.constant 1.000000e+00 : f32
    %500 = vector.broadcast %cst_126 : f32 to vector<8x32xf32>
    %501 = arith.addf %500, %499 : vector<8x32xf32>
    %502 = arith.divf %500, %501 : vector<8x32xf32>
    %503 = vector.extract_strided_slice %490 {offsets = [0, 64], sizes = [8, 32], strides = [1, 1]} : vector<8x128xf32> to vector<8x32xf32>
    %504 = math.tanh %503 : vector<8x32xf32>
    %505 = vector.extract_strided_slice %490 {offsets = [0, 96], sizes = [8, 32], strides = [1, 1]} : vector<8x128xf32> to vector<8x32xf32>
    %506 = arith.negf %505 : vector<8x32xf32>
    %507 = math.exp %506 : vector<8x32xf32>
    %cst_127 = arith.constant 1.000000e+00 : f32
    %508 = vector.broadcast %cst_127 : f32 to vector<8x32xf32>
    %509 = arith.addf %508, %507 : vector<8x32xf32>
    %510 = arith.divf %508, %509 : vector<8x32xf32>
    %511 = arith.mulf %502, %446 : vector<8x32xf32>
    %512 = arith.mulf %496, %504 : vector<8x32xf32>
    %513 = arith.addf %511, %512 : vector<8x32xf32>
    %514 = math.tanh %513 : vector<8x32xf32>
    %515 = arith.mulf %510, %514 : vector<8x32xf32>
    %516 = arith.index_cast %486 : i32 to index
    %c0_128 = arith.constant 0 : index
    %517 = vector.load %arg16[%516, %c0_128] : memref<64x64xf32, #tpu.memory_space<vmem>>, vector<8x32xf32>
    tpu.vector_store %arg16[%516, %c0_128], %515 {strides = array<i32>} : memref<64x64xf32, #tpu.memory_space<vmem>>, vector<8x32xf32>,
    %c7_i32_129 = arith.constant 7 : i32
    %518 = arith.subi %c7_i32_129, %c7_i32_121 : i32
    %c8_i32_130 = arith.constant 8 : i32
    %519 = arith.muli %518, %c8_i32_130 : i32
    %520 = tpu.assume_multiple %519, 8 : i32
    %521 = arith.index_cast %520 : i32 to index
    %c0_131 = arith.constant 0 : index
    %522 = vector.load %arg15[%521, %c0_131] : memref<64x128xf32, #tpu.memory_space<vmem>>, vector<8x128xf32>
    %cst_132 = arith.constant dense<0.000000e+00> : vector<8x128xf32>
    %523 = tpu.matmul %482, %14, %cst_132 {dimension_numbers = #tpu.dot_dimension_numbers<[1], [0], [0], [1], [0, 0, 1, 1], [], []>} : vector<8x32xf32>, vector<32x128xf32>, vector<8x128xf32> -> vector<8x128xf32>
    %524 = arith.addf %522, %523 : vector<8x128xf32>
    %525 = vector.extract_strided_slice %524 {offsets = [0, 0], sizes = [8, 32], strides = [1, 1]} : vector<8x128xf32> to vector<8x32xf32>
    %526 = arith.negf %525 : vector<8x32xf32>
    %527 = math.exp %526 : vector<8x32xf32>
    %cst_133 = arith.constant 1.000000e+00 : f32
    %528 = vector.broadcast %cst_133 : f32 to vector<8x32xf32>
    %529 = arith.addf %528, %527 : vector<8x32xf32>
    %530 = arith.divf %528, %529 : vector<8x32xf32>
    %531 = vector.extract_strided_slice %524 {offsets = [0, 32], sizes = [8, 32], strides = [1, 1]} : vector<8x128xf32> to vector<8x32xf32>
    %532 = arith.negf %531 : vector<8x32xf32>
    %533 = math.exp %532 : vector<8x32xf32>
    %cst_134 = arith.constant 1.000000e+00 : f32
    %534 = vector.broadcast %cst_134 : f32 to vector<8x32xf32>
    %535 = arith.addf %534, %533 : vector<8x32xf32>
    %536 = arith.divf %534, %535 : vector<8x32xf32>
    %537 = vector.extract_strided_slice %524 {offsets = [0, 64], sizes = [8, 32], strides = [1, 1]} : vector<8x128xf32> to vector<8x32xf32>
    %538 = math.tanh %537 : vector<8x32xf32>
    %539 = vector.extract_strided_slice %524 {offsets = [0, 96], sizes = [8, 32], strides = [1, 1]} : vector<8x128xf32> to vector<8x32xf32>
    %540 = arith.negf %539 : vector<8x32xf32>
    %541 = math.exp %540 : vector<8x32xf32>
    %cst_135 = arith.constant 1.000000e+00 : f32
    %542 = vector.broadcast %cst_135 : f32 to vector<8x32xf32>
    %543 = arith.addf %542, %541 : vector<8x32xf32>
    %544 = arith.divf %542, %543 : vector<8x32xf32>
    %545 = arith.mulf %536, %480 : vector<8x32xf32>
    %546 = arith.mulf %530, %538 : vector<8x32xf32>
    %547 = arith.addf %545, %546 : vector<8x32xf32>
    %548 = math.tanh %547 : vector<8x32xf32>
    %549 = arith.mulf %544, %548 : vector<8x32xf32>
    %550 = arith.index_cast %520 : i32 to index
    %c32_136 = arith.constant 32 : index
    %551 = vector.load %arg16[%550, %c32_136] : memref<64x64xf32, #tpu.memory_space<vmem>>, vector<8x32xf32>
    tpu.vector_store %arg16[%550, %c32_136], %549 {strides = array<i32>} : memref<64x64xf32, #tpu.memory_space<vmem>>, vector<8x32xf32>,
    %c8_i32_137 = arith.constant 8 : i32
    %c0_138 = arith.constant 0 : index
    %c0_139 = arith.constant 0 : index
    %552 = vector.load %arg16[%c0_138, %c0_139] : memref<64x64xf32, #tpu.memory_space<vmem>>, vector<64x64xf32>
    %c0_140 = arith.constant 0 : index
    %c0_141 = arith.constant 0 : index
    %553 = vector.load %arg8[%c0_140, %c0_141] : memref<64x128xf32, #tpu.memory_space<vmem>>, vector<64x128xf32>
    %cst_142 = arith.constant dense<0.000000e+00> : vector<64x128xf32>
    %554 = tpu.matmul %552, %553, %cst_142 {dimension_numbers = #tpu.dot_dimension_numbers<[1], [0], [0], [1], [0, 0, 1, 1], [], []>} : vector<64x64xf32>, vector<64x128xf32>, vector<64x128xf32> -> vector<64x128xf32>
    %c0_143 = arith.constant 0 : index
    %c0_144 = arith.constant 0 : index
    %555 = vector.load %arg9[%c0_143, %c0_144] : memref<1x128xf32, #tpu.memory_space<vmem>>, vector<1x128xf32>
    %556 = vector.broadcast %555 : vector<1x128xf32> to vector<64x128xf32>
    %557 = arith.addf %554, %556 : vector<64x128xf32>
    %c0_145 = arith.constant 0 : index
    %c0_146 = arith.constant 0 : index
    %558 = vector.load %arg12[%c0_145, %c0_146] : memref<64x128xf32, #tpu.memory_space<vmem>>, vector<64x128xf32>
    tpu.vector_store %arg12[%c0_145, %c0_146], %557 {strides = array<i32>} : memref<64x128xf32, #tpu.memory_space<vmem>>, vector<64x128xf32>,
    %c0_147 = arith.constant 0 : index
    %c0_148 = arith.constant 0 : index
    %559 = vector.load %arg11[%c0_147, %c0_148] : memref<64x128xf32, #tpu.memory_space<vmem>>, vector<64x128xf32>
    %560 = arith.addf %557, %559 : vector<64x128xf32>
    %cst_149 = arith.constant 1.000000e+00 : f32
    %561 = vector.broadcast %cst_149 : f32 to vector<64x128xf32>
    %562 = arith.mulf %560, %561 : vector<64x128xf32>
    %563 = tpu.iota {dimensions = array<i32: 1>} : vector<64x128xi32>
    %c16_i32 = arith.constant 16 : i32
    %564 = vector.broadcast %c16_i32 : i32 to vector<64x128xi32>
    %565 = arith.cmpi slt, %563, %564 : vector<64x128xi32>
    %cst_150 = arith.constant -1.000000e+30 : f32
    %566 = vector.broadcast %cst_150 : f32 to vector<64x128xf32>
    %567 = arith.select %565, %562, %566 : vector<64x128xi1>, vector<64x128xf32>
    %cst_151 = arith.constant dense<0xFF800000> : vector<64xf32>
    %568 = vector.multi_reduction <maximumf>, %567, %cst_151 [1] : vector<64x128xf32> to vector<64xf32>
    %569 = vector.shape_cast %568 : vector<64xf32> to vector<64x1xf32>
    %570 = vector.broadcast %569 : vector<64x1xf32> to vector<64x128xf32>
    %571 = arith.subf %567, %570 : vector<64x128xf32>
    %572 = math.exp %571 : vector<64x128xf32>
    %cst_152 = arith.constant dense<0.000000e+00> : vector<64xf32>
    %573 = vector.multi_reduction <add>, %572, %cst_152 [1] : vector<64x128xf32> to vector<64xf32>
    %574 = vector.shape_cast %573 : vector<64xf32> to vector<64x1xf32>
    %575 = tpu.reciprocal %574 {approx = true} : vector<64x1xf32> -> vector<64x1xf32>
    %576 = vector.broadcast %575 : vector<64x1xf32> to vector<64x128xf32>
    %577 = arith.mulf %572, %576 : vector<64x128xf32>
    %c0_153 = arith.constant 0 : index
    %c0_154 = arith.constant 0 : index
    %578 = vector.load %arg10[%c0_153, %c0_154] : memref<128x128xf32, #tpu.memory_space<vmem>>, vector<128x128xf32>
    %cst_155 = arith.constant dense<0.000000e+00> : vector<64x128xf32>
    %579 = tpu.matmul %577, %578, %cst_155 {dimension_numbers = #tpu.dot_dimension_numbers<[1], [0], [0], [1], [0, 0, 1, 1], [], []>} : vector<64x128xf32>, vector<128x128xf32>, vector<64x128xf32> -> vector<64x128xf32>
    %c0_156 = arith.constant 0 : index
    %c0_157 = arith.constant 0 : index
    %580 = vector.load %arg13[%c0_156, %c0_157] : memref<64x128xf32, #tpu.memory_space<vmem>>, vector<64x128xf32>
    tpu.vector_store %arg13[%c0_156, %c0_157], %579 {strides = array<i32>} : memref<64x128xf32, #tpu.memory_space<vmem>>, vector<64x128xf32>,
    return
  }
  func.func @transform_0(%arg0: i32) -> (i32, i32) {
    %c0_i32 = arith.constant 0 : i32
    %c0_i32_0 = arith.constant 0 : i32
    %c0_i32_1 = arith.constant 0 : i32
    return %c0_i32, %c0_i32_0 : i32, i32
  }
  func.func @transform_1(%arg0: i32) -> (i32, i32) {
    %c0_i32 = arith.constant 0 : i32
    %c0_i32_0 = arith.constant 0 : i32
    %c0_i32_1 = arith.constant 0 : i32
    return %c0_i32, %c0_i32_0 : i32, i32
  }
  func.func @transform_2(%arg0: i32) -> (i32, i32) {
    %c0_i32 = arith.constant 0 : i32
    %c0_i32_0 = arith.constant 0 : i32
    %c0_i32_1 = arith.constant 0 : i32
    return %c0_i32, %c0_i32_0 : i32, i32
  }
  func.func @transform_3(%arg0: i32) -> (i32, i32) {
    %c0_i32 = arith.constant 0 : i32
    %c0_i32_0 = arith.constant 0 : i32
    %c0_i32_1 = arith.constant 0 : i32
    return %c0_i32, %c0_i32_0 : i32, i32
  }
  func.func @transform_4(%arg0: i32) -> (i32, i32) {
    %c0_i32 = arith.constant 0 : i32
    %c0_i32_0 = arith.constant 0 : i32
    %c0_i32_1 = arith.constant 0 : i32
    return %c0_i32, %c0_i32_0 : i32, i32
  }
  func.func @transform_5(%arg0: i32) -> (i32, i32) {
    %c0_i32 = arith.constant 0 : i32
    %c0_i32_0 = arith.constant 0 : i32
    %c0_i32_1 = arith.constant 0 : i32
    return %c0_i32, %c0_i32_0 : i32, i32
  }
  func.func @transform_6(%arg0: i32) -> (i32, i32) {
    %c0_i32 = arith.constant 0 : i32
    %c0_i32_0 = arith.constant 0 : i32
    %c0_i32_1 = arith.constant 0 : i32
    return %c0_i32, %c0_i32_0 : i32, i32
  }
  func.func @transform_7(%arg0: i32) -> (i32, i32) {
    %c0_i32 = arith.constant 0 : i32
    %c0_i32_0 = arith.constant 0 : i32
    %c0_i32_1 = arith.constant 0 : i32
    return %c0_i32, %c0_i32_0 : i32, i32
  }
  func.func @transform_8(%arg0: i32) -> (i32, i32) {
    %c0_i32 = arith.constant 0 : i32
    %c0_i32_0 = arith.constant 0 : i32
    %c0_i32_1 = arith.constant 0 : i32
    return %c0_i32, %c0_i32_0 : i32, i32
  }
  func.func @transform_9(%arg0: i32) -> (i32, i32) {
    %c0_i32 = arith.constant 0 : i32
    %c0_i32_0 = arith.constant 0 : i32
    %c0_i32_1 = arith.constant 0 : i32
    return %c0_i32, %c0_i32_0 : i32, i32
  }
  func.func @transform_10(%arg0: i32) -> (i32, i32) {
    %c0_i32 = arith.constant 0 : i32
    %c0_i32_0 = arith.constant 0 : i32
    %c0_i32_1 = arith.constant 0 : i32
    return %c0_i32, %c0_i32_0 : i32, i32
  }
  func.func @transform_11(%arg0: i32) -> (i32, i32) {
    %c0_i32 = arith.constant 0 : i32
    %c0_i32_0 = arith.constant 0 : i32
    %c0_i32_1 = arith.constant 0 : i32
    return %c0_i32, %c0_i32_0 : i32, i32
  }
  func.func @transform_12(%arg0: i32) -> (i32, i32) {
    %c0_i32 = arith.constant 0 : i32
    %c0_i32_0 = arith.constant 0 : i32
    %c0_i32_1 = arith.constant 0 : i32
    return %c0_i32, %c0_i32_0 : i32, i32
  }
}

</mosaic_0001>

<bundles_post_ra>
// kernel: tpu_custom_call.1
= control target key start
LH: loop header
LB: loop body
LE: loop exit
PB: predicated region body
PF: predicated region fallthrough
CT: control target
= control target key end

     0   :  { %18 = vsyncpa [#allocation6], 0  ;;  %s4076_s0 = inlined_call_operand.vmem [shape: f32[64,16], index: 0, kind: input, shape index: {}]   ;;  %s4077_s1 = inlined_call_operand.hbm [shape: f32[16,128], index: 1, kind: input, shape index: {}]   ;;  %s4078_s2 = inlined_call_operand.vmem [shape: f32[32,128], index: 2, kind: input, shape index: {}]   ;;  %s4079_s3 = inlined_call_operand.vmem [shape: f32[1,128], index: 3, kind: input, shape index: {}]   ;;  %s4080_s4 = inlined_call_operand.hbm [shape: f32[16,128], index: 4, kind: input, shape index: {}]   ;;  %s4081_s5 = inlined_call_operand.hbm [shape: f32[32,128], index: 5, kind: input, shape index: {}]   ;;  %s4082_s6 = inlined_call_operand.vmem [shape: f32[1,128], index: 6, kind: input, shape index: {}]   ;;  %s4083_s7 = inlined_call_operand.vmem [shape: f32[64,128], index: 7, kind: input, shape index: {}]   ;;  %s4084_s8 = inlined_call_operand.vmem [shape: f32[1,128], index: 8, kind: input, shape index: {}]   ;;  %s4085_s9 = inlined_call_operand.hbm [shape: f32[128,128], index: 9, kind: input, shape index: {}]   ;;  %s4086_s10 = inlined_call_operand.hbm [shape: f32[64,128], index: 10, kind: input, shape index: {}]   ;;  %s4087_s11 = inlined_call_operand.hbm [shape: f32[64,128], index: 11, kind: output, shape index: {0}]   ;;  %s4088_s12 = inlined_call_operand.hbm [shape: f32[64,128], index: 12, kind: output, shape index: {1}]  }
   0x1   :  { %19 = vsyncpa [#allocation9], 0 }
   0x2   :  { %20 = vsyncpa [#allocation12], 0 }
   0x3   :  { %21 = vsyncpa [#allocation7], 0 }
   0x4   :  { %22 = vsyncpa [#allocation16], 0  ;;  %s3472_s21 = smov [#allocation8]   ;;  %s3473_s23 = smov [#allocation11]  }
   0x5   :  { %s46_s22 = sshll.u32 %s3472_s21, 4  ;;  %s76_s24 = sshll.u32 %s3473_s23, 4  ;;  %s47_s22 = int_to_ptr.vmem [resolvable:$true] %s46_s22  ;;  %s3551_s24 = int_to_ptr.vmem [resolvable:$true] %s76_s24 }
   0x6   :  { %s3308_s27 = scalar_lea.hbm %s4080_s4, 256 }
   0x7   :  { %p3309_p0 = scmp.ne.s32.totalorder %s4080_s4, %s3308_s27  ;;  %p3312_p1 = scmp.lt.u32.totalorder %s3308_s27, %s4080_s4 }
   0x9   :  { %p3314_p2 = pnand %p3312_p1, %p3309_p0 }
   0xb   :  { %3317 = shalt.err (!%p3314_p2)
}
   0xc   :  { %s3318_s14 = scalar_lea.vmem %s47_s22, 256  ;;  %p3323_p4 = scmp.lt.s32.totalorder %s47_s22, %s47_s22 }
   0xd   :  { %p3319_p3 = scmp.ne.s32.totalorder %s47_s22, %s3318_s14  ;;  %p3324_p5 = scmp.lt.s32.totalorder %s3318_s14, %s3318_s14 }
   0xf   :  { %p3325_p6 = por %p3324_p5, %p3323_p4 }
  0x11   :  { %p3326_p7 = pnand %p3325_p6, %p3319_p3 }
  0x13   :  { %3329 = shalt.err (!%p3326_p7)
}
  0x14   :  { %s3474_s15 = smov 128   ;;  %s3475_s16 = smov 8  }
  0x15   :  { %52 = dma.hbm_to_vmem [thread:$0]  %s4080_s4, 256, %s47_s22, [#allocation9], %s3474_s15, %s3474_s15, %s3475_s16  }
  0x16   :  { %s3330_s21 = scalar_lea.hbm %s4085_s9, 2048 }
  0x17   :  { %p3331_p8 = scmp.ne.s32.totalorder %s4085_s9, %s3330_s21  ;;  %p3334_p9 = scmp.lt.u32.totalorder %s3330_s21, %s4085_s9 }
  0x19   :  { %p3336_p10 = pnand %p3334_p9, %p3331_p8 }
  0x1b   :  { %3339 = shalt.err (!%p3336_p10)
}
  0x1c   :  { %s3340_s28 = scalar_lea.vmem %s3551_s24, 2048  ;;  %p3345_p12 = scmp.lt.s32.totalorder %s3551_s24, %s3551_s24 }
  0x1d   :  { %p3341_p11 = scmp.ne.s32.totalorder %s3551_s24, %s3340_s28  ;;  %p3346_p13 = scmp.lt.s32.totalorder %s3340_s28, %s3340_s28 }
  0x1f   :  { %p3347_p0 = por %p3346_p13, %p3345_p12 }
  0x21   :  { %p3348_p1 = pnand %p3347_p0, %p3341_p11 }
  0x23   :  { %3351 = shalt.err (!%p3348_p1)
}
  0x24   :  { %82 = dma.hbm_to_vmem [thread:$0]  %s4085_s9, 2048, %s3551_s24, [#allocation12], %s3474_s15, %s3474_s15, %s3475_s16  }
  0x25   :  { %s3476_s29 = smov [#allocation5]   ;;  %s3477_s13 = smov [#allocation10]  }
  0x26   :  { %s30_s30 = sshll.u32 %s3476_s29, 4  ;;  %s58_s14 = sshll.u32 %s3477_s13, 4  ;;  %s31_s30 = int_to_ptr.vmem [resolvable:$true] %s30_s30  ;;  %s3588_s14 = int_to_ptr.vmem [resolvable:$true] %s58_s14 }
  0x27   :  { %s3352_s19 = scalar_lea.hbm %s4077_s1, 256 }
  0x28   :  { %p3353_p2 = scmp.ne.s32.totalorder %s4077_s1, %s3352_s19  ;;  %p3356_p3 = scmp.lt.u32.totalorder %s3352_s19, %s4077_s1 }
  0x2a   :  { %p3358_p4 = pnand %p3356_p3, %p3353_p2 }
  0x2c   :  { %3361 = shalt.err (!%p3358_p4)
}
  0x2d   :  { %s3362_s9 = scalar_lea.vmem %s31_s30, 256  ;;  %p3367_p6 = scmp.lt.s32.totalorder %s31_s30, %s31_s30 }
  0x2e   :  { %p3363_p5 = scmp.ne.s32.totalorder %s31_s30, %s3362_s9  ;;  %p3368_p7 = scmp.lt.s32.totalorder %s3362_s9, %s3362_s9 }
  0x30   :  { %p3369_p8 = por %p3368_p7, %p3367_p6 }
  0x32   :  { %p3370_p9 = pnand %p3369_p8, %p3363_p5 }
  0x34   :  { %3373 = shalt.err (!%p3370_p9)
}
  0x35   :  { %36 = dma.hbm_to_vmem [thread:$0]  %s4077_s1, 256, %s31_s30, [#allocation6], %s3474_s15, %s3474_s15, %s3475_s16  }
  0x36   :  { %s3374_s4 = scalar_lea.hbm %s4081_s5, 512 }
  0x37   :  { %p3375_p10 = scmp.ne.s32.totalorder %s4081_s5, %s3374_s4  ;;  %p3378_p11 = scmp.lt.u32.totalorder %s3374_s4, %s4081_s5 }
  0x39   :  { %p3380_p12 = pnand %p3378_p11, %p3375_p10 }
  0x3b   :  { %3383 = shalt.err (!%p3380_p12)
}
  0x3c   :  { %s3384_s18 = scalar_lea.vmem %s3588_s14, 512  ;;  %p3389_p0 = scmp.lt.s32.totalorder %s3588_s14, %s3588_s14 }
  0x3d   :  { %p3385_p13 = scmp.ne.s32.totalorder %s3588_s14, %s3384_s18  ;;  %p3390_p1 = scmp.lt.s32.totalorder %s3384_s18, %s3384_s18 }
  0x3f   :  { %p3391_p2 = por %p3390_p1, %p3389_p0 }
  0x41   :  { %p3392_p3 = pnand %p3391_p2, %p3385_p13 }
  0x43   :  { %3395 = shalt.err (!%p3392_p3)
}
  0x44   :  { %64 = dma.hbm_to_vmem [thread:$0]  %s4081_s5, 512, %s3588_s14, [#allocation9], %s3474_s15, %s3474_s15, %s3475_s16  }
  0x45   :  { %s3478_s19 = smov [#allocation13]   ;;  %s3396_s25 = scalar_lea.hbm %s4086_s10, 1024 }
  0x46   :  { %s88_s20 = sshll.u32 %s3478_s19, 4  ;;  %p3397_p4 = scmp.ne.s32.totalorder %s4086_s10, %s3396_s25  ;;  %s89_s20 = int_to_ptr.vmem [resolvable:$true] %s88_s20 }
  0x47   :  { %p3400_p5 = scmp.lt.u32.totalorder %s3396_s25, %s4086_s10 }
  0x49   :  { %p3402_p6 = pnand %p3400_p5, %p3397_p4 }
  0x4b   :  { %3405 = shalt.err (!%p3402_p6)
}
  0x4c   :  { %s3406_s28 = scalar_lea.vmem %s89_s20, 1024  ;;  %p3411_p8 = scmp.lt.s32.totalorder %s89_s20, %s89_s20 }
  0x4d   :  { %p3407_p7 = scmp.ne.s32.totalorder %s89_s20, %s3406_s28  ;;  %p3412_p9 = scmp.lt.s32.totalorder %s3406_s28, %s3406_s28 }
  0x4f   :  { %p3413_p10 = por %p3412_p9, %p3411_p8 }
  0x51   :  { %p3414_p11 = pnand %p3413_p10, %p3407_p7 }
  0x53   :  { %3417 = shalt.err (!%p3414_p11)
}
  0x54   :  { %94 = dma.hbm_to_vmem [thread:$0]  %s4086_s10, 1024, %s89_s20, [#allocation12], %s3474_s15, %s3474_s15, %s3475_s16  }
  0x55   :  { %3462 = dma.done.wait [#allocation6], 256  }
  0x56   :  { %3463 = vsyncadd [#allocation6], 4294967040 }
  0x57   :  { %3464 = dma.done.wait [#allocation9], 768  }
  0x58   :  { %3465 = vsyncadd [#allocation9], 4294966528 }
  0x59   :  { %3466 = dma.done.wait [#allocation12], 3072  }
  0x5a   :  { %3467 = vsyncadd [#allocation12], 4294964224  ;;  %vm127_vm0 = vcmask 130048   ;;  %v118_v0 = vld [vmem:[#allocation5] sm:$0xff]  ;;  %v119_v1 = vld [vmem:[#allocation5 + $0x8] sm:$0xff]  ;;  %v3479_v13 = vmov 0.0|0.0  }
  0x5b   :  { %v265_v2 = vld [vmem:[#allocation8] sm:$0xff]  ;;  %v2980_v3 = vpack.c.bf16 %v119_v1, %v118_v0  ;;  %v266_v4 = vld [vmem:[#allocation8 + $0x8] sm:$0xff]  ;;  %v110_v5 = vld [vmem:[%s4076_s0] sm:$0xff]  ;;  %vm3480_vm1 = vmmov 0   ;;  %v3481_v21 = vmov 0.0   ;;  %vm396_vm2 = vcmask 261120  }
  0x5c   :  { %v114_v6 = vld [vmem:[%s4076_s0 + $0x20] sm:$0xff]  ;;  %v2984_v7 = vpack.c.bf16 %v266_v4, %v265_v2  ;;  %2704 = vmatprep.mubr.msk.f32.mxu0 %vm127_vm0, %v110_v5  ;;  %v392_v9 = vld [vmem:[#allocation10 + $0x8] sm:$0xff]  ;;  %v112_v14 = vld [vmem:[%s4076_s0 + $0x10] sm:$0xff]  ;;  %vm602_vm3 = vcmask 523520   ;;  %vm2102_vm4 = vcmask 523264  }
  0x5d   :  { %2726 = vmatprep.mubr.msk.f32.mxu1 %vm127_vm0, %v114_v6  ;;  %v391_v8 = vld [vmem:[#allocation10] sm:$0xff]  ;;  %2981 = vmatprep.subr.bf16.mxu0 %v2980_v3  ;;  %v111_v10 = vld [vmem:[%s4076_s0 + $0x8] sm:$0xff]  ;;  %v393_v15 = vld [vmem:[#allocation10 + $0x10] sm:$0xff] }
  0x5e   :  { %3132 = vmatprep.subr.bf16.mxu1 %v2984_v7  ;;  %2983 = vmatpush3.bf16.msra.mxu0 %v2980_v3  ;;  %v115_v11 = vld [vmem:[%s4076_s0 + $0x28] sm:$0xff]  ;;  %v3654_v12 = vpack.c.bf16 %v392_v9, %v391_v8  ;;  %v394_v16 = vld [vmem:[#allocation10 + $0x18] sm:$0xff]  ;;  %v116_v17 = vld [vmem:[%s4076_s0 + $0x30] sm:$0xff] }
  0x5f   :  { %3133 = vmatpush3.bf16.msra.mxu1 %v2984_v7  ;;  %2985 = vmatprep.subr.bf16.mxu0 %v2984_v7  ;;  %v113_v18 = vld [vmem:[%s4076_s0 + $0x18] sm:$0xff]  ;;  %v3673_v20 = vpack.c.bf16 %v394_v16, %v393_v15  ;;  %v387_v22 = vld [vmem:[%s4078_s2] sm:$0xff]  ;;  %v388_v23 = vld [vmem:[%s4078_s2 + $0x8] sm:$0xff] }
  0x60   :  { %2994 = vmatprep.subr.bf16.mxu1 %v3479_v13  ;;  %v117_v19 = vld [vmem:[%s4076_s0 + $0x38] sm:$0xff]  ;;  %v3700_v24 = vpack.c.bf16 %v388_v23, %v387_v22  ;;  %v389_v25 = vld [vmem:[%s4078_s2 + $0x10] sm:$0xff]  ;;  %v2503_v28 = vld [vmem:[%s4079_s3] ss:$0 sm:$0xff]  ;;  %s3482_s3 = smov 64  }
  0x61   :  { %2705 = vmatmul.mubr.msk.f32.vlgmr.msra.gmra.mrb[0].mxu0 %vm127_vm0, %v111_v10  ;;  %v390_v26 = vld [vmem:[%s4078_s2 + $0x18] sm:$0xff]  ;;  %v2512_v29 = vld [vmem:[%s4082_s6] ss:$0 sm:$0xff]  ;;  %s3483_s6 = smov 32  }
  0x62   :  { %2727 = vmatmul.mubr.msk.f32.vlgmr.msra.gmra.mrb[0].mxu1 %vm127_vm0, %v115_v11  ;;  %2987 = vmatpush3.bf16.msra.mxu0 %v2984_v7  ;;  %v3713_v27 = vpack.c.bf16 %v390_v26, %v389_v25 }
  0x63   :  { %2996 = vmatpush3.bf16.msra.mxu1 %v3654_v12  ;;  %2707 = vmatprep.mubr.msk.f32.mxu0 %vm127_vm0, %v112_v14 }
  0x64   :  { %2729 = vmatprep.mubr.msk.f32.mxu1 %vm127_vm0, %v116_v17  ;;  %2997 = vmatprep.subr.bf16.mxu1 %v3479_v13 }
  0x65   :  { %2708 = vmatmul.mubr.msk.f32.gmra.mrb[2].mxu0 %vm127_vm0, %v113_v18  ;;  %2988 = vmatprep.subr.bf16.mxu0 %v3479_v13 }
  0x66   :  { %2730 = vmatmul.mubr.msk.f32.gmra.mrb[2].mxu1 %vm127_vm0, %v117_v19  ;;  %2710 = vmatprep.mubr.msk.f32.mxu0 %vm127_vm0, %v114_v6 }
  0x67   :  { %2999 = vmatpush3.bf16.msra.mxu1 %v3673_v20  ;;  %2751 = vmatprep.mubr.msk.f32.mxu1 %vm3480_vm1, %v3481_v21 }
  0x68   :  { %3006 = vmatprep.subr.bf16.mxu1 %v3479_v13 }
  0x69   :  { %2711 = vmatmul.mubr.msk.f32.gmra.mrb[4].mxu0 %vm127_vm0, %v115_v11 }
  0x6a   :  { %2752 = vmatmul.mubr.f32.vlgmr.msra.gmra.mrb[4].mxu1 %v3481_v21  ;;  %2713 = vmatprep.mubr.msk.f32.mxu0 %vm127_vm0, %v116_v17 }
  0x6b   :  { %3008 = vmatpush3.bf16.msra.mxu1 %v3654_v12  ;;  %2773 = vmatprep.mubr.msk.f32.mxu1 %vm3480_vm1, %v3481_v21 }
  0x6c   :  { %3009 = vmatprep.subr.bf16.mxu1 %v3479_v13 }
  0x6d   :  { %2714 = vmatmul.mubr.msk.f32.gmra.mrb[6].mxu0 %vm127_vm0, %v117_v19 }
  0x6e   :  { %2720 = vmatprep.mubr.msk.f32.mxu0 %vm127_vm0, %v110_v5 }
  0x6f   :  { %3011 = vmatpush3.bf16.msra.mxu1 %v3673_v20 }
  0x70   :  { %3018 = vmatprep.subr.bf16.mxu1 %v3479_v13 }
  0x71   :  { %2721 = vmatmul.mubr.msk.f32.vlgmr.msra.gmra.mrb[8].mxu0 %vm127_vm0, %v111_v10 }
  0x72   :  { %2990 = vmatpush3.bf16.msra.mxu0 %v3700_v24  ;;  %2723 = vmatprep.mubr.msk.f32.mxu0 %vm127_vm0, %v112_v14 }
  0x73   :  { %2991 = vmatprep.subr.bf16.mxu0 %v3479_v13 }
  0x75   :  { %2724 = vmatmul.mubr.msk.f32.gmra.mrb[10].mxu0 %vm127_vm0, %v113_v18 }
  0x76   :  { %2993 = vmatpush3.bf16.msra.mxu0 %v3713_v27  ;;  %2740 = vmatprep.mubr.msk.f32.mxu0 %vm3480_vm1, %v3481_v21 }
  0x77   :  { %3000 = vmatprep.subr.bf16.mxu0 %v3479_v13 }
  0x79   :  { %2741 = vmatmul.mubr.f32.vlgmr.msra.gmra.mrb[12].mxu0 %v3481_v21 }
  0x7a   :  { %3002 = vmatpush3.bf16.msra.mxu0 %v3700_v24  ;;  %2762 = vmatprep.mubr.msk.f32.mxu0 %vm3480_vm1, %v3481_v21 }
  0x7b   :  { %3003 = vmatprep.subr.bf16.mxu0 %v3479_v13 }
  0x7e   :  { %3005 = vmatpush3.bf16.msra.mxu0 %v3713_v27 }
  0x7f   :  { %3012 = vmatprep.subr.bf16.mxu0 %v3479_v13 }
 0x134   :  { %v2706_v30 = vpop.f32.mrb[0].mxu0 }
 0x135   :  { %v3734_v31 = vadd.f32 %v2706_v30, %v2503_v28  ;;  %v2728_v32 = vpop.f32.mrb[0].mxu1  ;;  %v218_v33 = vpop.f32.mrb[1].mxu0 }
 0x136   :  { %v3736_v34 = vadd.f32 %v2728_v32, %v2512_v29  ;;  %v360_v35 = vpop.f32.mrb[1].mxu1  ;;  %v219_v1 = vadd.f32 %v2503_v28, %v218_v33 }
 0x137   :  { %v3738_v36 = vadd.f32 %v2512_v29, %v360_v35 }
 0x138   :  { %v2709_v37 = vpop.f32.mrb[2].mxu0 }
 0x139   :  { %v3740_v38 = vadd.f32 %v2709_v37, %v2503_v28  ;;  %v2731_v39 = vpop.f32.mrb[2].mxu1  ;;  %v228_v40 = vpop.f32.mrb[3].mxu0 }
 0x13a   :  { %v3742_v41 = vadd.f32 %v2503_v28, %v228_v40  ;;  %v370_v42 = vpop.f32.mrb[3].mxu1  ;;  %v376_v44 = vadd.f32 %v2731_v39, %v2512_v29 }
 0x13b   :  { %v3744_v43 = vadd.f32 %v2512_v29, %v370_v42 }
 0x13c   :  { %v2712_v45 = vpop.f32.mrb[4].mxu0 }
 0x13d   :  { %v3746_v46 = vadd.f32 %v2712_v45, %v2503_v28  ;;  %v568_v47 = vpop.f32.mrb[4].mxu1  ;;  %v238_v48 = vpop.f32.mrb[5].mxu0 }
 0x13e   :  { %v572_v49 = vadd.f32 %v568_v47, %v376_v44  ;;  %v3748_v50 = vadd.f32 %v2503_v28, %v238_v48  ;;  %v2753_v51 = vpop.f32.mrb[5].mxu1 }
 0x140   :  { %3148 = vtanh.f32 %v572_v49  ;;  %v2715_v52 = vpop.f32.mrb[6].mxu0  ;;  %v2522_v6 = vmul.f32 -1.442695, %v572_v49 }
 0x141   :  { %v3750_v53 = vadd.f32 %v2715_v52, %v2503_v28  ;;  %v248_v54 = vpop.f32.mrb[7].mxu0 }
 0x142   :  { %v3752_v55 = vadd.f32 %v2503_v28, %v248_v54 }
 0x144   :  { %v2722_v56 = vpop.f32.mrb[8].mxu0 }
 0x145   :  { %v3754_v57 = vadd.f32 %v2722_v56, %v2512_v29  ;;  %v340_v58 = vpop.f32.mrb[9].mxu0 }
 0x146   :  { %v3756_v59 = vadd.f32 %v2512_v29, %v340_v58 }
 0x148   :  { %v2725_v60 = vpop.f32.mrb[10].mxu0 }
 0x149   :  { %v3758_v61 = vadd.f32 %v2725_v60, %v2512_v29  ;;  %v350_v62 = vpop.f32.mrb[11].mxu0 }
 0x14a   :  { %v3149_v63 = vpop.eup %3148  ;;  %v3760_v0 = vadd.f32 %v2512_v29, %v350_v62 }
 0x14b   :  { %582 = vrot.lane.b32.xlu0 %v3149_v63, %s3482_s3 }
 0x14c   :  { %v466_v2 = vpop.f32.mrb[12].mxu0 }
 0x14d   :  { %v470_v3 = vadd.f32 %v466_v2, %v219_v1  ;;  %v2742_v4 = vpop.f32.mrb[13].mxu0 }
 0x14f   :  { %3150 = vtanh.f32 %v470_v3  ;;  %v2521_v8 = vmul.f32 -1.442695, %v470_v3 }
 0x150   :  { %3152 = vpow2.f32 %v2522_v6 }
 0x151   :  { %3154 = vpow2.f32 %v2521_v8 }
 0x159   :  { %v3151_v5 = vpop.eup %3150 }
 0x15a   :  { %480 = vrot.lane.b32.xlu0 %v3151_v5, %s3482_s3  ;;  %v3153_v7 = vpop.eup %3152 }
 0x15b   :  { %v576_v9 = vadd.f32 1.0, %v3153_v7  ;;  %v3155_v10 = vpop.eup %3154 }
 0x15c   :  { %v474_v16 = vadd.f32 1.0, %v3155_v10 }
 0x15d   :  { %3156 = vrcp.f32 %v576_v9 }
 0x15e   :  { %3158 = vrcp.f32 %v474_v16 }
 0x167   :  { %v3157_v11 = vpop.eup %3156 }
 0x168   :  { %v3159_v17 = vpop.eup %3158  ;;  %v580_v22 = vmul.f32 0.0, %v3157_v11 }
 0x169   :  { %v478_v28 = vmul.f32 0.0, %v3159_v17 }
 0x1bd   :  { %v583_v14 = vpop.permute.xlu0 %582 }
 0x1be   :  { %v585_v15 = vmul.f32 %v3157_v11, %v583_v14 }
 0x1c0   :  { %587 = vrot.lane.b32.xlu1 %v585_v15, %s3483_s6 }
 0x1cc   :  { %v481_v18 = vpop.permute.xlu0 %480 }
 0x1cd   :  { %v483_v19 = vmul.f32 %v3159_v17, %v481_v18 }
 0x1cf   :  { %485 = vrot.lane.b32.xlu1 %v483_v19, %s3483_s6 }
 0x232   :  { %v588_v23 = vpop.permute.xlu1 %587 }
 0x233   :  { %v590_v25 = vadd.f32 %v588_v23, %v580_v22 }
 0x235   :  { %3160 = vtanh.f32 %v590_v25 }
 0x23f   :  { %v3161_v26 = vpop.eup %3160 }
 0x240   :  { %593 = vrot.lane.b32.xlu0 %v3161_v26, %s3482_s3 }
 0x241   :  { %v486_v29 = vpop.permute.xlu1 %485 }
 0x242   :  { %v488_v30 = vadd.f32 %v486_v29, %v478_v28 }
 0x244   :  { %3162 = vtanh.f32 %v488_v30 }
 0x24e   :  { %v3163_v32 = vpop.eup %3162 }
 0x24f   :  { %491 = vrot.lane.b32.xlu1 %v3163_v32, %s3482_s3 }
 0x2b2   :  { %v594_v33 = vpop.permute.xlu0 %593 }
 0x2b3   :  { %v3768_v35 = vmul.f32 %v3157_v11, %v594_v33 }
 0x2b5   :  { %711 = vrot.lane.b32.xlu0 %v3768_v35, %s3483_s6 }
 0x2c1   :  { %v492_v37 = vpop.permute.xlu1 %491 }
 0x2c2   :  { %v494_v39 = vmul.f32 %v3159_v17, %v492_v37 }
 0x2c4   :  { %496 = vrot.lane.b32.xlu1 %v494_v39, %s3483_s6 }
 0x327   :  { %v712_v40 = vpop.permute.xlu0 %711 }
 0x328   :  { %2774 = vmatmul.mubr.msk.f32.vlgmr.msra.gmra.mrb[6].mxu1 %vm396_vm2, %v712_v40 }
 0x329   :  { %3020 = vmatpush3.bf16.msra.mxu1 %v3654_v12  ;;  %2795 = vmatprep.mubr.msk.f32.mxu1 %vm3480_vm1, %v3481_v21 }
 0x32a   :  { %3021 = vmatprep.subr.bf16.mxu1 %v3479_v13 }
 0x32d   :  { %3023 = vmatpush3.bf16.msra.mxu1 %v3673_v20 }
 0x32e   :  { %3030 = vmatprep.subr.bf16.mxu1 %v3479_v13 }
 0x336   :  { %v497_v42 = vpop.permute.xlu1 %496 }
 0x337   :  { %499 = vst.msk [vmem:[#allocation4] sm:$0xff] %vm396_vm2, %v497_v42  ;;  %2763 = vmatmul.mubr.msk.f32.vlgmr.msra.gmra.mrb[14].mxu0 %vm396_vm2, %v497_v42 }
 0x338   :  { %3014 = vmatpush3.bf16.msra.mxu0 %v3700_v24  ;;  %2784 = vmatprep.mubr.msk.f32.mxu0 %vm3480_vm1, %v3481_v21 }
 0x339   :  { %3015 = vmatprep.subr.bf16.mxu0 %v3479_v13 }
 0x33c   :  { %3017 = vmatpush3.bf16.msra.mxu0 %v3713_v27 }
 0x33d   :  { %3024 = vmatprep.subr.bf16.mxu0 %v3479_v13 }
 0x3fb   :  { %v781_v44 = vpop.f32.mrb[6].mxu1 }
 0x3fc   :  { %v785_v45 = vadd.f32 %v781_v44, %v3744_v43  ;;  %v2775_v47 = vpop.f32.mrb[7].mxu1 }
 0x3fe   :  { %3164 = vtanh.f32 %v785_v45  ;;  %v2526_v56 = vmul.f32 -1.442695, %v785_v45 }
 0x408   :  { %v3165_v48 = vpop.eup %3164 }
 0x409   :  { %795 = vrot.lane.b32.xlu0 %v3165_v48, %s3482_s3 }
 0x40a   :  { %v674_v49 = vpop.f32.mrb[14].mxu0 }
 0x40b   :  { %v678_v51 = vadd.f32 %v674_v49, %v3734_v31  ;;  %v2764_v52 = vpop.f32.mrb[15].mxu0 }
 0x40d   :  { %3166 = vtanh.f32 %v678_v51  ;;  %v2524_v60 = vmul.f32 -1.442695, %v678_v51 }
 0x40e   :  { %3168 = vpow2.f32 %v2526_v56 }
 0x40f   :  { %3170 = vpow2.f32 %v2524_v60 }
 0x417   :  { %v3167_v54 = vpop.eup %3166 }
 0x418   :  { %688 = vrot.lane.b32.xlu1 %v3167_v54, %s3482_s3  ;;  %v3169_v58 = vpop.eup %3168 }
 0x419   :  { %v789_v62 = vadd.f32 1.0, %v3169_v58  ;;  %v3171_v43 = vpop.eup %3170 }
 0x41a   :  { %v682_v3 = vadd.f32 1.0, %v3171_v43 }
 0x41b   :  { %3172 = vrcp.f32 %v789_v62 }
 0x41c   :  { %3174 = vrcp.f32 %v682_v3 }
 0x425   :  { %v3173_v63 = vpop.eup %3172 }
 0x426   :  { %v3175_v31 = vpop.eup %3174  ;;  %v793_v6 = vmul.f32 %v3173_v63, %v590_v25 }
 0x427   :  { %v686_v10 = vmul.f32 %v3175_v31, %v488_v30 }
 0x47b   :  { %v796_v1 = vpop.permute.xlu0 %795 }
 0x47c   :  { %v798_v2 = vmul.f32 %v3173_v63, %v796_v1 }
 0x47e   :  { %800 = vrot.lane.b32.xlu0 %v798_v2, %s3483_s6 }
 0x48a   :  { %v689_v4 = vpop.permute.xlu1 %688 }
 0x48b   :  { %v691_v5 = vmul.f32 %v3175_v31, %v689_v4 }
 0x48d   :  { %693 = vrot.lane.b32.xlu1 %v691_v5, %s3483_s6 }
 0x4f0   :  { %v801_v7 = vpop.permute.xlu0 %800 }
 0x4f1   :  { %v803_v8 = vadd.f32 %v801_v7, %v793_v6 }
 0x4f3   :  { %3176 = vtanh.f32 %v803_v8 }
 0x4fd   :  { %v3177_v9 = vpop.eup %3176 }
 0x4fe   :  { %806 = vrot.lane.b32.xlu0 %v3177_v9, %s3482_s3 }
 0x4ff   :  { %v694_v11 = vpop.permute.xlu1 %693 }
 0x500   :  { %v696_v14 = vadd.f32 %v694_v11, %v686_v10 }
 0x502   :  { %3178 = vtanh.f32 %v696_v14 }
 0x50c   :  { %v3179_v15 = vpop.eup %3178 }
 0x50d   :  { %699 = vrot.lane.b32.xlu1 %v3179_v15, %s3482_s3 }
 0x570   :  { %v807_v16 = vpop.permute.xlu0 %806 }
 0x571   :  { %v3796_v17 = vmul.f32 %v3173_v63, %v807_v16 }
 0x573   :  { %923 = vrot.lane.b32.xlu0 %v3796_v17, %s3483_s6 }
 0x57f   :  { %v700_v18 = vpop.permute.xlu1 %699 }
 0x580   :  { %v702_v19 = vmul.f32 %v3175_v31, %v700_v18 }
 0x582   :  { %704 = vrot.lane.b32.xlu1 %v702_v19, %s3483_s6 }
 0x5e5   :  { %v924_v22 = vpop.permute.xlu0 %923 }
 0x5e6   :  { %2796 = vmatmul.mubr.msk.f32.vlgmr.msra.gmra.mrb[8].mxu1 %vm396_vm2, %v924_v22 }
 0x5e7   :  { %3032 = vmatpush3.bf16.msra.mxu1 %v3654_v12  ;;  %2817 = vmatprep.mubr.msk.f32.mxu1 %vm3480_vm1, %v3481_v21 }
 0x5e8   :  { %3033 = vmatprep.subr.bf16.mxu1 %v3479_v13 }
 0x5eb   :  { %3035 = vmatpush3.bf16.msra.mxu1 %v3673_v20 }
 0x5ec   :  { %3042 = vmatprep.subr.bf16.mxu1 %v3479_v13 }
 0x5f4   :  { %v705_v23 = vpop.permute.xlu1 %704 }
 0x5f5   :  { %708 = vst.msk [vmem:[#allocation4 + $0x8] sm:$0xff] %vm396_vm2, %v705_v23  ;;  %2785 = vmatmul.mubr.msk.f32.vlgmr.msra.gmra.mrb[16].mxu0 %vm396_vm2, %v705_v23 }
 0x5f6   :  { %3026 = vmatpush3.bf16.msra.mxu0 %v3700_v24  ;;  %2806 = vmatprep.mubr.msk.f32.mxu0 %vm3480_vm1, %v3481_v21 }
 0x5f7   :  { %3027 = vmatprep.subr.bf16.mxu0 %v3479_v13 }
 0x5fa   :  { %3029 = vmatpush3.bf16.msra.mxu0 %v3713_v27 }
 0x5fb   :  { %3036 = vmatprep.subr.bf16.mxu0 %v3479_v13 }
 0x6b9   :  { %v993_v25 = vpop.f32.mrb[8].mxu1 }
 0x6ba   :  { %v997_v26 = vadd.f32 %v993_v25, %v3736_v34  ;;  %v2797_v28 = vpop.f32.mrb[9].mxu1 }
 0x6bc   :  { %3180 = vtanh.f32 %v997_v26  ;;  %v2530_v39 = vmul.f32 -1.442695, %v997_v26 }
 0x6c6   :  { %v3181_v29 = vpop.eup %3180 }
 0x6c7   :  { %1007 = vrot.lane.b32.xlu0 %v3181_v29, %s3482_s3 }
 0x6c8   :  { %v886_v30 = vpop.f32.mrb[16].mxu0 }
 0x6c9   :  { %v890_v32 = vadd.f32 %v886_v30, %v3742_v41  ;;  %v2786_v33 = vpop.f32.mrb[17].mxu0 }
 0x6cb   :  { %3182 = vtanh.f32 %v890_v32  ;;  %v2528_v42 = vmul.f32 -1.442695, %v890_v32 }
 0x6cc   :  { %3184 = vpow2.f32 %v2530_v39 }
 0x6cd   :  { %3186 = vpow2.f32 %v2528_v42 }
 0x6d5   :  { %v3183_v37 = vpop.eup %3182 }
 0x6d6   :  { %900 = vrot.lane.b32.xlu1 %v3183_v37, %s3482_s3  ;;  %v3185_v40 = vpop.eup %3184 }
 0x6d7   :  { %v1001_v44 = vadd.f32 1.0, %v3185_v40  ;;  %v3187_v34 = vpop.eup %3186 }
 0x6d8   :  { %v894_v49 = vadd.f32 1.0, %v3187_v34 }
 0x6d9   :  { %3188 = vrcp.f32 %v1001_v44 }
 0x6da   :  { %3190 = vrcp.f32 %v894_v49 }
 0x6e3   :  { %v3189_v45 = vpop.eup %3188 }
 0x6e4   :  { %v3191_v41 = vpop.eup %3190  ;;  %v1005_v54 = vmul.f32 %v3189_v45, %v803_v8 }
 0x6e5   :  { %v898_v62 = vmul.f32 %v3191_v41, %v696_v14 }
 0x739   :  { %v1008_v47 = vpop.permute.xlu0 %1007 }
 0x73a   :  { %v1010_v48 = vmul.f32 %v3189_v45, %v1008_v47 }
 0x73c   :  { %1012 = vrot.lane.b32.xlu0 %v1010_v48, %s3483_s6 }
 0x748   :  { %v901_v51 = vpop.permute.xlu1 %900 }
 0x749   :  { %v903_v52 = vmul.f32 %v3191_v41, %v901_v51 }
 0x74b   :  { %905 = vrot.lane.b32.xlu1 %v903_v52, %s3483_s6 }
 0x7ae   :  { %v1013_v56 = vpop.permute.xlu0 %1012 }
 0x7af   :  { %v1015_v58 = vadd.f32 %v1013_v56, %v1005_v54 }
 0x7b1   :  { %3192 = vtanh.f32 %v1015_v58 }
 0x7bb   :  { %v3193_v60 = vpop.eup %3192 }
 0x7bc   :  { %1018 = vrot.lane.b32.xlu0 %v3193_v60, %s3482_s3 }
 0x7bd   :  { %v906_v43 = vpop.permute.xlu1 %905 }
 0x7be   :  { %v908_v63 = vadd.f32 %v906_v43, %v898_v62 }
 0x7c0   :  { %3194 = vtanh.f32 %v908_v63 }
 0x7ca   :  { %v3195_v1 = vpop.eup %3194 }
 0x7cb   :  { %911 = vrot.lane.b32.xlu1 %v3195_v1, %s3482_s3 }
 0x82e   :  { %v1019_v2 = vpop.permute.xlu0 %1018 }
 0x82f   :  { %v3824_v3 = vmul.f32 %v3189_v45, %v1019_v2 }
 0x831   :  { %1135 = vrot.lane.b32.xlu0 %v3824_v3, %s3483_s6 }
 0x83d   :  { %v912_v31 = vpop.permute.xlu1 %911 }
 0x83e   :  { %v914_v4 = vmul.f32 %v3191_v41, %v912_v31 }
 0x840   :  { %916 = vrot.lane.b32.xlu1 %v914_v4, %s3483_s6 }
 0x8a3   :  { %v1136_v5 = vpop.permute.xlu0 %1135 }
 0x8a4   :  { %2818 = vmatmul.mubr.msk.f32.vlgmr.msra.gmra.mrb[10].mxu1 %vm396_vm2, %v1136_v5 }
 0x8a5   :  { %3044 = vmatpush3.bf16.msra.mxu1 %v3654_v12  ;;  %2839 = vmatprep.mubr.msk.f32.mxu1 %vm3480_vm1, %v3481_v21 }
 0x8a6   :  { %3045 = vmatprep.subr.bf16.mxu1 %v3479_v13 }
 0x8a9   :  { %3047 = vmatpush3.bf16.msra.mxu1 %v3673_v20 }
 0x8aa   :  { %3054 = vmatprep.subr.bf16.mxu1 %v3479_v13 }
 0x8b2   :  { %v917_v6 = vpop.permute.xlu1 %916 }
 0x8b3   :  { %920 = vst.msk [vmem:[#allocation4 + $0x10] sm:$0xff] %vm396_vm2, %v917_v6  ;;  %2807 = vmatmul.mubr.msk.f32.vlgmr.msra.gmra.mrb[18].mxu0 %vm396_vm2, %v917_v6 }
 0x8b4   :  { %3038 = vmatpush3.bf16.msra.mxu0 %v3700_v24  ;;  %2828 = vmatprep.mubr.msk.f32.mxu0 %vm3480_vm1, %v3481_v21 }
 0x8b5   :  { %3039 = vmatprep.subr.bf16.mxu0 %v3479_v13 }
 0x8b8   :  { %3041 = vmatpush3.bf16.msra.mxu0 %v3713_v27 }
 0x8b9   :  { %3048 = vmatprep.subr.bf16.mxu0 %v3479_v13 }
 0x977   :  { %v1205_v7 = vpop.f32.mrb[10].mxu1 }
 0x978   :  { %v1209_v8 = vadd.f32 %v1205_v7, %v3738_v36  ;;  %v2819_v9 = vpop.f32.mrb[11].mxu1 }
 0x97a   :  { %3196 = vtanh.f32 %v1209_v8  ;;  %v2534_v18 = vmul.f32 -1.442695, %v1209_v8 }
 0x984   :  { %v3197_v10 = vpop.eup %3196 }
 0x985   :  { %1219 = vrot.lane.b32.xlu0 %v3197_v10, %s3482_s3 }
 0x986   :  { %v1098_v11 = vpop.f32.mrb[18].mxu0 }
 0x987   :  { %v1102_v14 = vadd.f32 %v1098_v11, %v3740_v38  ;;  %v2808_v15 = vpop.f32.mrb[19].mxu0 }
 0x989   :  { %3198 = vtanh.f32 %v1102_v14  ;;  %v2532_v22 = vmul.f32 -1.442695, %v1102_v14 }
 0x98a   :  { %3200 = vpow2.f32 %v2534_v18 }
 0x98b   :  { %3202 = vpow2.f32 %v2532_v22 }
 0x993   :  { %v3199_v16 = vpop.eup %3198 }
 0x994   :  { %1112 = vrot.lane.b32.xlu1 %v3199_v16, %s3482_s3  ;;  %v3201_v19 = vpop.eup %3200 }
 0x995   :  { %v1213_v23 = vadd.f32 1.0, %v3201_v19  ;;  %v3203_v36 = vpop.eup %3202 }
 0x996   :  { %v1106_v29 = vadd.f32 1.0, %v3203_v36 }
 0x997   :  { %3204 = vrcp.f32 %v1213_v23 }
 0x998   :  { %3206 = vrcp.f32 %v1106_v29 }
 0x9a1   :  { %v3205_v25 = vpop.eup %3204 }
 0x9a2   :  { %v3207_v38 = vpop.eup %3206  ;;  %v1217_v33 = vmul.f32 %v3205_v25, %v1015_v58 }
 0x9a3   :  { %v1110_v42 = vmul.f32 %v3207_v38, %v908_v63 }
 0x9f7   :  { %v1220_v26 = vpop.permute.xlu0 %1219 }
 0x9f8   :  { %v1222_v28 = vmul.f32 %v3205_v25, %v1220_v26 }
 0x9fa   :  { %1224 = vrot.lane.b32.xlu0 %v1222_v28, %s3483_s6 }
 0xa06   :  { %v1113_v30 = vpop.permute.xlu1 %1112 }
 0xa07   :  { %v1115_v32 = vmul.f32 %v3207_v38, %v1113_v30 }
 0xa09   :  { %1117 = vrot.lane.b32.xlu1 %v1115_v32, %s3483_s6 }
 0xa6c   :  { %v1225_v37 = vpop.permute.xlu0 %1224 }
 0xa6d   :  { %v1227_v39 = vadd.f32 %v1225_v37, %v1217_v33 }
 0xa6f   :  { %3208 = vtanh.f32 %v1227_v39 }
 0xa79   :  { %v3209_v40 = vpop.eup %3208 }
 0xa7a   :  { %1230 = vrot.lane.b32.xlu0 %v3209_v40, %s3482_s3 }
 0xa7b   :  { %v1118_v44 = vpop.permute.xlu1 %1117 }
 0xa7c   :  { %v1120_v34 = vadd.f32 %v1118_v44, %v1110_v42 }
 0xa7e   :  { %3210 = vtanh.f32 %v1120_v34 }
 0xa88   :  { %v3211_v45 = vpop.eup %3210 }
 0xa89   :  { %1123 = vrot.lane.b32.xlu1 %v3211_v45, %s3482_s3 }
 0xaec   :  { %v1231_v47 = vpop.permute.xlu0 %1230 }
 0xaed   :  { %v3852_v48 = vmul.f32 %v3205_v25, %v1231_v47 }
 0xaef   :  { %1346 = vrot.lane.b32.xlu0 %v3852_v48, %s3483_s6 }
 0xafb   :  { %v1124_v49 = vpop.permute.xlu1 %1123 }
 0xafc   :  { %v1126_v41 = vmul.f32 %v3207_v38, %v1124_v49 }
 0xafe   :  { %1128 = vrot.lane.b32.xlu1 %v1126_v41, %s3483_s6 }
 0xb61   :  { %v1347_v51 = vpop.permute.xlu0 %1346 }
 0xb62   :  { %2840 = vmatmul.mubr.msk.f32.vlgmr.msra.gmra.mrb[12].mxu1 %vm396_vm2, %v1347_v51 }
 0xb63   :  { %3056 = vmatpush3.bf16.msra.mxu1 %v3654_v12  ;;  %2861 = vmatprep.mubr.msk.f32.mxu1 %vm3480_vm1, %v3481_v21 }
 0xb64   :  { %3057 = vmatprep.subr.bf16.mxu1 %v3479_v13 }
 0xb67   :  { %3059 = vmatpush3.bf16.msra.mxu1 %v3673_v20 }
 0xb68   :  { %3066 = vmatprep.subr.bf16.mxu1 %v3479_v13 }
 0xb70   :  { %v1129_v52 = vpop.permute.xlu1 %1128 }
 0xb71   :  { %1132 = vst.msk [vmem:[#allocation4 + $0x18] sm:$0xff] %vm396_vm2, %v1129_v52  ;;  %2829 = vmatmul.mubr.msk.f32.vlgmr.msra.gmra.mrb[20].mxu0 %vm396_vm2, %v1129_v52 }
 0xb72   :  { %3050 = vmatpush3.bf16.msra.mxu0 %v3700_v24  ;;  %2850 = vmatprep.mubr.msk.f32.mxu0 %vm3480_vm1, %v3481_v21 }
 0xb73   :  { %3051 = vmatprep.subr.bf16.mxu0 %v3479_v13 }
 0xb76   :  { %3053 = vmatpush3.bf16.msra.mxu0 %v3713_v27 }
 0xb77   :  { %3060 = vmatprep.subr.bf16.mxu0 %v3479_v13 }
 0xc35   :  { %v1416_v54 = vpop.f32.mrb[12].mxu1 }
 0xc36   :  { %v1420_v56 = vadd.f32 %v1416_v54, %v3758_v61  ;;  %v2841_v58 = vpop.f32.mrb[13].mxu1 }
 0xc38   :  { %3212 = vtanh.f32 %v1420_v56  ;;  %v2538_v2 = vmul.f32 -1.442695, %v1420_v56 }
 0xc42   :  { %v3213_v60 = vpop.eup %3212 }
 0xc43   :  { %1430 = vrot.lane.b32.xlu0 %v3213_v60, %s3482_s3 }
 0xc44   :  { %v1310_v62 = vpop.f32.mrb[20].mxu0 }
 0xc45   :  { %v1314_v43 = vadd.f32 %v1310_v62, %v3748_v50  ;;  %v2830_v63 = vpop.f32.mrb[21].mxu0 }
 0xc47   :  { %3214 = vtanh.f32 %v1314_v43  ;;  %v2536_v4 = vmul.f32 -1.442695, %v1314_v43 }
 0xc48   :  { %3216 = vpow2.f32 %v2538_v2 }
 0xc49   :  { %3218 = vpow2.f32 %v2536_v4 }
 0xc51   :  { %v3215_v1 = vpop.eup %3214 }
 0xc52   :  { %1324 = vrot.lane.b32.xlu1 %v3215_v1, %s3482_s3  ;;  %v3217_v31 = vpop.eup %3216 }
 0xc53   :  { %v1424_v5 = vadd.f32 1.0, %v3217_v31  ;;  %v3219_v61 = vpop.eup %3218 }
 0xc54   :  { %v1318_v9 = vadd.f32 1.0, %v3219_v61 }
 0xc55   :  { %3220 = vrcp.f32 %v1424_v5 }
 0xc56   :  { %3222 = vrcp.f32 %v1318_v9 }
 0xc5f   :  { %v3221_v6 = vpop.eup %3220 }
 0xc60   :  { %v3223_v50 = vpop.eup %3222  ;;  %v1428_v14 = vmul.f32 %v3221_v6, %v1227_v39 }
 0xc61   :  { %v1322_v19 = vmul.f32 %v3223_v50, %v1120_v34 }
 0xcb5   :  { %v1431_v7 = vpop.permute.xlu0 %1430 }
 0xcb6   :  { %v1433_v8 = vmul.f32 %v3221_v6, %v1431_v7 }
 0xcb8   :  { %1435 = vrot.lane.b32.xlu0 %v1433_v8, %s3483_s6 }
 0xcc4   :  { %v1325_v10 = vpop.permute.xlu1 %1324 }
 0xcc5   :  { %v1327_v11 = vmul.f32 %v3223_v50, %v1325_v10 }
 0xcc7   :  { %1329 = vrot.lane.b32.xlu1 %v1327_v11, %s3483_s6 }
 0xd2a   :  { %v1436_v15 = vpop.permute.xlu0 %1435 }
 0xd2b   :  { %v1438_v16 = vadd.f32 %v1436_v15, %v1428_v14 }
 0xd2d   :  { %3224 = vtanh.f32 %v1438_v16 }
 0xd37   :  { %v3225_v18 = vpop.eup %3224 }
 0xd38   :  { %1441 = vrot.lane.b32.xlu0 %v3225_v18, %s3482_s3 }
 0xd39   :  { %v1330_v22 = vpop.permute.xlu1 %1329 }
 0xd3a   :  { %v1332_v23 = vadd.f32 %v1330_v22, %v1322_v19 }
 0xd3c   :  { %3226 = vtanh.f32 %v1332_v23 }
 0xd46   :  { %v3227_v36 = vpop.eup %3226 }
 0xd47   :  { %1335 = vrot.lane.b32.xlu1 %v3227_v36, %s3482_s3 }
 0xdaa   :  { %v1442_v25 = vpop.permute.xlu0 %1441 }
 0xdab   :  { %v3880_v26 = vmul.f32 %v3221_v6, %v1442_v25 }
 0xdad   :  { %1556 = vrot.lane.b32.xlu0 %v3880_v26, %s3483_s6 }
 0xdb9   :  { %v1336_v28 = vpop.permute.xlu1 %1335 }
 0xdba   :  { %v1338_v29 = vmul.f32 %v3223_v50, %v1336_v28 }
 0xdbc   :  { %1340 = vrot.lane.b32.xlu1 %v1338_v29, %s3483_s6 }
 0xe1f   :  { %v1557_v38 = vpop.permute.xlu0 %1556 }
 0xe20   :  { %2862 = vmatmul.mubr.msk.f32.vlgmr.msra.gmra.mrb[14].mxu1 %vm396_vm2, %v1557_v38 }
 0xe21   :  { %3068 = vmatpush3.bf16.msra.mxu1 %v3654_v12  ;;  %2883 = vmatprep.mubr.msk.f32.mxu1 %vm3480_vm1, %v3481_v21 }
 0xe22   :  { %3069 = vmatprep.subr.bf16.mxu1 %v3479_v13 }
 0xe25   :  { %3071 = vmatpush3.bf16.msra.mxu1 %v3673_v20 }
 0xe26   :  { %3078 = vmatprep.subr.bf16.mxu1 %v3479_v13 }
 0xe2e   :  { %v3892_v30 = vpop.permute.xlu1 %1340 }
 0xe2f   :  { %2851 = vmatmul.mubr.msk.f32.vlgmr.msra.gmra.mrb[22].mxu0 %vm396_vm2, %v3892_v30 }
 0xe30   :  { %3062 = vmatpush3.bf16.msra.mxu0 %v3700_v24  ;;  %2872 = vmatprep.mubr.msk.f32.mxu0 %vm3480_vm1, %v3481_v21 }
 0xe31   :  { %3063 = vmatprep.subr.bf16.mxu0 %v3479_v13 }
 0xe34   :  { %3065 = vmatpush3.bf16.msra.mxu0 %v3713_v27 }
 0xe35   :  { %3072 = vmatprep.subr.bf16.mxu0 %v3479_v13 }
 0xef3   :  { %v1626_v32 = vpop.f32.mrb[14].mxu1 }
 0xef4   :  { %v1630_v33 = vadd.f32 %v1626_v32, %v3760_v0  ;;  %v2863_v37 = vpop.f32.mrb[15].mxu1 }
 0xef6   :  { %3228 = vtanh.f32 %v1630_v33  ;;  %v2542_v45 = vmul.f32 -1.442695, %v1630_v33 }
 0xf00   :  { %v3229_v39 = vpop.eup %3228 }
 0xf01   :  { %1640 = vrot.lane.b32.xlu0 %v3229_v39, %s3482_s3 }
 0xf02   :  { %v1520_v40 = vpop.f32.mrb[22].mxu0 }
 0xf03   :  { %v1524_v42 = vadd.f32 %v1520_v40, %v3746_v46  ;;  %v2852_v44 = vpop.f32.mrb[23].mxu0 }
 0xf05   :  { %3230 = vtanh.f32 %v1524_v42  ;;  %v2540_v49 = vmul.f32 -1.442695, %v1524_v42 }
 0xf06   :  { %3232 = vpow2.f32 %v2542_v45 }
 0xf07   :  { %3234 = vpow2.f32 %v2540_v49 }
 0xf0f   :  { %v3231_v34 = vpop.eup %3230 }
 0xf10   :  { %1534 = vrot.lane.b32.xlu1 %v3231_v34, %s3482_s3  ;;  %v3233_v47 = vpop.eup %3232 }
 0xf11   :  { %v1634_v41 = vadd.f32 1.0, %v3233_v47  ;;  %v3235_v0 = vpop.eup %3234 }
 0xf12   :  { %v1528_v56 = vadd.f32 1.0, %v3235_v0 }
 0xf13   :  { %3236 = vrcp.f32 %v1634_v41 }
 0xf14   :  { %3238 = vrcp.f32 %v1528_v56 }
 0xf1d   :  { %v3237_v51 = vpop.eup %3236 }
 0xf1e   :  { %v3239_v46 = vpop.eup %3238  ;;  %v1638_v62 = vmul.f32 %v3237_v51, %v1438_v16 }
 0xf1f   :  { %v1532_v2 = vmul.f32 %v3239_v46, %v1332_v23 }
 0xf73   :  { %v1641_v52 = vpop.permute.xlu0 %1640 }
 0xf74   :  { %v1643_v54 = vmul.f32 %v3237_v51, %v1641_v52 }
 0xf76   :  { %1645 = vrot.lane.b32.xlu0 %v1643_v54, %s3483_s6 }
 0xf82   :  { %v1535_v58 = vpop.permute.xlu1 %1534 }
 0xf83   :  { %v1537_v60 = vmul.f32 %v3239_v46, %v1535_v58 }
 0xf85   :  { %1539 = vrot.lane.b32.xlu1 %v1537_v60, %s3483_s6 }
 0xfe8   :  { %v1646_v43 = vpop.permute.xlu0 %1645 }
 0xfe9   :  { %v1648_v63 = vadd.f32 %v1646_v43, %v1638_v62 }
 0xfeb   :  { %3240 = vtanh.f32 %v1648_v63 }
 0xff5   :  { %v3241_v1 = vpop.eup %3240 }
 0xff6   :  { %1651 = vrot.lane.b32.xlu0 %v3241_v1, %s3482_s3 }
 0xff7   :  { %v1540_v31 = vpop.permute.xlu1 %1539 }
 0xff8   :  { %v1542_v4 = vadd.f32 %v1540_v31, %v1532_v2 }
 0xffa   :  { %3242 = vtanh.f32 %v1542_v4 }
0x1004   :  { %v3243_v5 = vpop.eup %3242 }
0x1005   :  { %1545 = vrot.lane.b32.xlu1 %v3243_v5, %s3482_s3 }
0x1068   :  { %v1652_v61 = vpop.permute.xlu0 %1651 }
0x1069   :  { %v3910_v6 = vmul.f32 %v3237_v51, %v1652_v61 }
0x106b   :  { %1766 = vrot.lane.b32.xlu0 %v3910_v6, %s3483_s6 }
0x1077   :  { %v1546_v7 = vpop.permute.xlu1 %1545 }
0x1078   :  { %v1548_v8 = vmul.f32 %v3239_v46, %v1546_v7 }
0x107a   :  { %1550 = vrot.lane.b32.xlu1 %v1548_v8, %s3483_s6 }
0x10dd   :  { %v1767_v9 = vpop.permute.xlu0 %1766 }
0x10de   :  { %2884 = vmatmul.mubr.msk.f32.vlgmr.msra.gmra.mrb[16].mxu1 %vm396_vm2, %v1767_v9 }
0x10df   :  { %3080 = vmatpush3.bf16.msra.mxu1 %v3654_v12  ;;  %2905 = vmatprep.mubr.msk.f32.mxu1 %vm3480_vm1, %v3481_v21 }
0x10e0   :  { %3081 = vmatprep.subr.bf16.mxu1 %v3479_v13 }
0x10e3   :  { %3083 = vmatpush3.bf16.msra.mxu1 %v3673_v20 }
0x10ec   :  { %v3921_v50 = vpop.permute.xlu1 %1550 }
0x10ed   :  { %2873 = vmatmul.mubr.msk.f32.vlgmr.msra.gmra.mrb[24].mxu0 %vm396_vm2, %v3921_v50 }
0x10ee   :  { %3074 = vmatpush3.bf16.msra.mxu0 %v3700_v24  ;;  %2894 = vmatprep.mubr.msk.f32.mxu0 %vm3480_vm1, %v3481_v21 }
0x10ef   :  { %3075 = vmatprep.subr.bf16.mxu0 %v3479_v13 }
0x10f2   :  { %3077 = vmatpush3.bf16.msra.mxu0 %v3713_v27 }
0x11b1   :  { %v1836_v12 = vpop.f32.mrb[16].mxu1 }
0x11b2   :  { %v1840_v10 = vadd.f32 %v1836_v12, %v3754_v57  ;;  %v2885_v11 = vpop.f32.mrb[17].mxu1 }
0x11b4   :  { %3244 = vtanh.f32 %v1840_v10  ;;  %v2546_v21 = vmul.f32 -1.442695, %v1840_v10 }
0x11be   :  { %v3245_v20 = vpop.eup %3244 }
0x11bf   :  { %1850 = vrot.lane.b32.xlu0 %v3245_v20, %s3482_s3 }
0x11c0   :  { %v1730_v14 = vpop.f32.mrb[24].mxu0 }
0x11c1   :  { %v1734_v15 = vadd.f32 %v1730_v14, %v3752_v55  ;;  %v2874_v16 = vpop.f32.mrb[25].mxu0 }
0x11c2   :  { %v2087_v16 = vld [vmem:[%s4083_s7] sm:$0xff] }
0x11c3   :  { %3246 = vtanh.f32 %v1734_v15  ;;  %v2544_v27 = vmul.f32 -1.442695, %v1734_v15 }
0x11c4   :  { %3248 = vpow2.f32 %v2546_v21  ;;  %v2089_v21 = vld [vmem:[%s4083_s7 + $0x10] sm:$0xff] }
0x11c5   :  { %3250 = vpow2.f32 %v2544_v27  ;;  %v2090_v27 = vld [vmem:[%s4083_s7 + $0x18] sm:$0xff] }
0x11cd   :  { %v3247_v24 = vpop.eup %3246 }
0x11ce   :  { %1744 = vrot.lane.b32.xlu1 %v3247_v24, %s3482_s3  ;;  %v3249_v13 = vpop.eup %3248  ;;  %v2088_v24 = vld [vmem:[%s4083_s7 + $0x8] sm:$0xff] }
0x11cf   :  { %v1844_v18 = vadd.f32 1.0, %v3249_v13  ;;  %v3251_v57 = vpop.eup %3250  ;;  %v3084_v13 = vpack.c.bf16 %v2088_v24, %v2087_v16 }
0x11d0   :  { %v1738_v36 = vadd.f32 1.0, %v3251_v57  ;;  %v2091_v57 = vld [vmem:[%s4083_s7 + $0x20] sm:$0xff] }
0x11d1   :  { %3252 = vrcp.f32 %v1844_v18  ;;  %v3088_v18 = vpack.c.bf16 %v2090_v27, %v2089_v21  ;;  %3085 = vmatprep.subr.bf16.mxu0 %v3084_v13 }
0x11d2   :  { %3254 = vrcp.f32 %v1738_v36 }
0x11db   :  { %v3253_v19 = vpop.eup %3252 }
0x11dc   :  { %v3255_v55 = vpop.eup %3254  ;;  %v1848_v29 = vmul.f32 %v3253_v19, %v1648_v63 }
0x11dd   :  { %v1742_v37 = vmul.f32 %v3255_v55, %v1542_v4 }
0x1231   :  { %v1851_v22 = vpop.permute.xlu0 %1850 }
0x1232   :  { %v1853_v23 = vmul.f32 %v3253_v19, %v1851_v22 }
0x1234   :  { %1855 = vrot.lane.b32.xlu0 %v1853_v23, %s3483_s6 }
0x1240   :  { %v1745_v25 = vpop.permute.xlu1 %1744 }
0x1241   :  { %v1747_v28 = vmul.f32 %v3255_v55, %v1745_v25 }
0x1243   :  { %1749 = vrot.lane.b32.xlu1 %v1747_v28, %s3483_s6 }
0x12a6   :  { %v1856_v38 = vpop.permute.xlu0 %1855 }
0x12a7   :  { %v1858_v32 = vadd.f32 %v1856_v38, %v1848_v29 }
0x12a9   :  { %3256 = vtanh.f32 %v1858_v32 }
0x12b3   :  { %v3257_v33 = vpop.eup %3256 }
0x12b4   :  { %1861 = vrot.lane.b32.xlu0 %v3257_v33, %s3482_s3 }
0x12b5   :  { %v1750_v39 = vpop.permute.xlu1 %1749 }
0x12b6   :  { %v1752_v40 = vadd.f32 %v1750_v39, %v1742_v37 }
0x12b8   :  { %3258 = vtanh.f32 %v1752_v40 }
0x12c2   :  { %v3259_v42 = vpop.eup %3258 }
0x12c3   :  { %1755 = vrot.lane.b32.xlu1 %v3259_v42, %s3482_s3 }
0x1326   :  { %v1862_v44 = vpop.permute.xlu0 %1861 }
0x1327   :  { %v1864_v34 = vmul.f32 %v3253_v19, %v1862_v44  ;;  %v2092_v19 = vld [vmem:[%s4083_s7 + $0x28] sm:$0xff] }
0x1328   :  { %v3092_v22 = vpack.c.bf16 %v2092_v19, %v2091_v57  ;;  %v2246_v57 = vld [vmem:[#allocation13 + $0x30] sm:$0xff] }
0x1329   :  { %1975 = vrot.lane.b32.xlu0 %v1864_v34, %s3483_s6 }
0x1335   :  { %v1756_v45 = vpop.permute.xlu1 %1755 }
0x1336   :  { %v1758_v47 = vmul.f32 %v3255_v55, %v1756_v45 }
0x1338   :  { %1760 = vrot.lane.b32.xlu1 %v1758_v47, %s3483_s6  ;;  %v2256_v47 = vlaneseq }
0x139b   :  { %v1976_v49 = vpop.permute.xlu0 %1975 }
0x139c   :  { %2906 = vmatmul.mubr.msk.f32.vlgmr.msra.gmra.mrb[18].mxu1 %vm396_vm2, %v1976_v49  ;;  %v2551_v49 = vld [vmem:[%s4084_s8] ss:$0 sm:$0xff]  ;;  %s3484_s8 = smov [#allocation14]  }
0x139d   :  { %s2473_s4 = sshll.u32 %s3484_s8, 4  ;;  %s2474_s4 = int_to_ptr.vmem [resolvable:$true] %s2473_s4 }
0x139e   :  { %s3418_s22 = scalar_lea.vmem %s2474_s4, 1024  ;;  %p3423_p13 = scmp.lt.s32.totalorder %s2474_s4, %s2474_s4 }
0x139f   :  { %p3419_p12 = scmp.ne.s32.totalorder %s2474_s4, %s3418_s22  ;;  %p3424_p0 = scmp.lt.s32.totalorder %s3418_s22, %s3418_s22 }
0x13a1   :  { %p3425_p1 = por %p3424_p0, %p3423_p13 }
0x13a3   :  { %p3426_p2 = pnand %p3425_p1, %p3419_p12 }
0x13aa   :  { %v3941_v41 = vpop.permute.xlu1 %1760 }
0x13ab   :  { %2895 = vmatmul.mubr.msk.f32.vlgmr.msra.gmra.mrb[26].mxu0 %vm396_vm2, %v3941_v41 }
0x13ac   :  { %3087 = vmatpush3.bf16.msra.mxu0 %v3084_v13  ;;  %v2247_v13 = vld [vmem:[#allocation13 + $0x38] sm:$0xff] }
0x13ad   :  { %3089 = vmatprep.subr.bf16.mxu0 %v3088_v18 }
0x13b0   :  { %3091 = vmatpush3.bf16.msra.mxu0 %v3088_v18 }
0x13b1   :  { %3093 = vmatprep.subr.bf16.mxu0 %v3092_v22 }
0x13b4   :  { %3095 = vmatpush3.bf16.msra.mxu0 %v3092_v22 }
0x146f   :  { %v2045_v0 = vpop.f32.mrb[18].mxu1 }
0x1470   :  { %v2049_v51 = vadd.f32 %v2045_v0, %v3756_v59  ;;  %v2907_v52 = vpop.f32.mrb[19].mxu1 }
0x1472   :  { %3260 = vtanh.f32 %v2049_v51  ;;  %v2550_v62 = vmul.f32 -1.442695, %v2049_v51  ;;  %v2241_v51 = vld [vmem:[#allocation13 + $0x8] sm:$0xff] }
0x147c   :  { %v3261_v54 = vpop.eup %3260 }
0x147d   :  { %2059 = vrot.lane.b32.xlu0 %v3261_v54, %s3482_s3 }
0x147e   :  { %v1940_v56 = vpop.f32.mrb[26].mxu0 }
0x147f   :  { %v1944_v46 = vadd.f32 %v1940_v56, %v3750_v53  ;;  %v2896_v58 = vpop.f32.mrb[27].mxu0  ;;  %v2240_v56 = vld [vmem:[#allocation13] sm:$0xff] }
0x1481   :  { %3262 = vtanh.f32 %v1944_v46  ;;  %v2548_v63 = vmul.f32 -1.442695, %v1944_v46 }
0x1482   :  { %3264 = vpow2.f32 %v2550_v62 }
0x1483   :  { %3266 = vpow2.f32 %v2548_v63 }
0x148b   :  { %v3263_v60 = vpop.eup %3262 }
0x148c   :  { %1954 = vrot.lane.b32.xlu1 %v3263_v60, %s3482_s3  ;;  %v3265_v43 = vpop.eup %3264 }
0x148d   :  { %v2053_v1 = vadd.f32 1.0, %v3265_v43  ;;  %v3267_v59 = vpop.eup %3266  ;;  %v2243_v43 = vld [vmem:[#allocation13 + $0x18] sm:$0xff] }
0x148e   :  { %v1948_v5 = vadd.f32 1.0, %v3267_v59 }
0x148f   :  { %3268 = vrcp.f32 %v2053_v1 }
0x1490   :  { %3270 = vrcp.f32 %v1948_v5 }
0x1499   :  { %v3269_v2 = vpop.eup %3268 }
0x149a   :  { %v3271_v53 = vpop.eup %3270  ;;  %v2057_v8 = vmul.f32 %v3269_v2, %v1858_v32 }
0x149b   :  { %v1952_v11 = vmul.f32 %v3271_v53, %v1752_v40 }
0x14ef   :  { %v2060_v31 = vpop.permute.xlu0 %2059 }
0x14f0   :  { %v2062_v4 = vmul.f32 %v3269_v2, %v2060_v31 }
0x14f2   :  { %2064 = vrot.lane.b32.xlu0 %v2062_v4, %s3483_s6 }
0x14fe   :  { %v1955_v61 = vpop.permute.xlu1 %1954 }
0x14ff   :  { %v1957_v7 = vmul.f32 %v3271_v53, %v1955_v61 }
0x1501   :  { %1959 = vrot.lane.b32.xlu1 %v1957_v7, %s3483_s6 }
0x1564   :  { %v2065_v9 = vpop.permute.xlu0 %2064 }
0x1565   :  { %v2067_v12 = vadd.f32 %v2065_v9, %v2057_v8  ;;  %v2245_v8 = vld [vmem:[#allocation13 + $0x28] sm:$0xff] }
0x1567   :  { %3272 = vtanh.f32 %v2067_v12 }
0x1571   :  { %v3273_v10 = vpop.eup %3272 }
0x1572   :  { %2070 = vrot.lane.b32.xlu0 %v3273_v10, %s3482_s3 }
0x1573   :  { %v1960_v20 = vpop.permute.xlu1 %1959 }
0x1574   :  { %v1962_v14 = vadd.f32 %v1960_v20, %v1952_v11  ;;  %v2244_v11 = vld [vmem:[#allocation13 + $0x20] sm:$0xff] }
0x1576   :  { %3274 = vtanh.f32 %v1962_v14 }
0x1580   :  { %v3275_v15 = vpop.eup %3274 }
0x1581   :  { %1965 = vrot.lane.b32.xlu1 %v3275_v15, %s3482_s3 }
0x1585   :  { %1866 = vrot.lane.b32.xlu1 %v1864_v34, %s3482_s3 }
0x1589   :  { %1446 = vrot.lane.b32.xlu1 %v3880_v26, %s3482_s3  ;;  %v2093_v26 = vld [vmem:[%s4083_s7 + $0x30] sm:$0xff] }
0x158d   :  { %1023 = vrot.lane.b32.xlu1 %v3824_v3, %s3482_s3  ;;  %v2094_v3 = vld [vmem:[%s4083_s7 + $0x38] sm:$0xff] }
0x1591   :  { %598 = vrot.lane.b32.xlu1 %v3768_v35, %s3482_s3  ;;  %v3096_v35 = vpack.c.bf16 %v2094_v3, %v2093_v26 }
0x1593   :  { %3097 = vmatprep.subr.bf16.mxu0 %v3096_v35 }
0x1594   :  { %3099 = vmatpush3.bf16.msra.mxu0 %v3096_v35 }
0x15e4   :  { %v2071_v23 = vpop.permute.xlu0 %2070 }
0x15e5   :  { %v2073_v36 = vmul.f32 %v3269_v2, %v2071_v23  ;;  %v2242_v2 = vld [vmem:[#allocation13 + $0x10] sm:$0xff]  ;;  %v2339_v23 = vld [vmem:[#allocation11] sm:$0xff] }
0x15e7   :  { %2075 = vrot.lane.b32.xlu0 %v2073_v36, %s3482_s3  ;;  %v2340_v36 = vld [vmem:[#allocation11 + $0x8] sm:$0xff] }
0x15eb   :  { %1656 = vrot.lane.b32.xlu0 %v3910_v6, %s3482_s3 }
0x15ef   :  { %1235 = vrot.lane.b32.xlu0 %v3852_v48, %s3482_s3 }
0x15f3   :  { %811 = vrot.lane.b32.xlu0 %v3796_v17, %s3482_s3  ;;  %v1966_v55 = vpop.permute.xlu1 %1965 }
0x15f4   :  { %v1968_v25 = vmul.f32 %v3271_v53, %v1966_v55  ;;  %v2341_v55 = vld [vmem:[#allocation11 + $0x10] sm:$0xff] }
0x15f7   :  { %1970 = vrot.lane.b32.xlu0 %v1968_v25, %s3483_s6  ;;  %v1867_v28 = vpop.permute.xlu1 %1866  ;;  %v3100_v25 = vpack.c.bf16 %v2340_v36, %v2339_v23 }
0x15f8   :  { %1869 = vst.msk [vmem:[#allocation4 + $0x8] sm:$0xff] %vm602_vm3, %v1867_v28  ;;  %v2342_v28 = vld [vmem:[#allocation11 + $0x18] sm:$0xff] }
0x15f9   :  { %3101 = vmatprep.subr.bf16.mxu1 %v3100_v25 }
0x15fa   :  { %3103 = vmatpush3.bf16.msra.mxu1 %v3100_v25 }
0x15fb   :  { %v1447_v29 = vpop.permute.xlu1 %1446 }
0x15fc   :  { %1449 = vst.msk [vmem:[#allocation4 + $0x18] sm:$0xff] %vm602_vm3, %v1447_v29  ;;  %v3104_v29 = vpack.c.bf16 %v2342_v28, %v2341_v55 }
0x15fe   :  { %3105 = vmatprep.subr.bf16.mxu1 %v3104_v29 }
0x15ff   :  { %v1024_v38 = vpop.permute.xlu1 %1023  ;;  %v2080_v37 = vld [vmem:[#allocation4 + $0x8] sm:$0xff]  ;;  %3107 = vmatpush3.bf16.msra.mxu1 %v3104_v29 }
0x1600   :  { %1027 = vst.msk [vmem:[#allocation4 + $0x28] sm:$0xff] %vm602_vm3, %v1024_v38  ;;  %v2343_v38 = vld [vmem:[#allocation11 + $0x20] sm:$0xff] }
0x1601   :  { %1553 = vst.msk [vmem:[#allocation4 + $0x28] sm:$0xff] %vm396_vm2, %v3921_v50 }
0x1603   :  { %v599_v48 = vpop.permute.xlu1 %598  ;;  %v2082_v40 = vld [vmem:[#allocation4 + $0x18] sm:$0xff] }
0x1604   :  { %603 = vst.msk [vmem:[#allocation4 + $0x38] sm:$0xff] %vm602_vm3, %v599_v48  ;;  %v2344_v48 = vld [vmem:[#allocation11 + $0x28] sm:$0xff] }
0x1659   :  { %v2076_v17 = vpop.permute.xlu0 %2075 }
0x165a   :  { %2078 = vst.msk [vmem:[#allocation4] sm:$0xff] %vm602_vm3, %v2076_v17  ;;  %v3108_v17 = vpack.c.bf16 %v2344_v48, %v2343_v38 }
0x165c   :  { %3109 = vmatprep.subr.bf16.mxu1 %v3108_v17 }
0x165d   :  { %v1657_v6 = vpop.permute.xlu0 %1656  ;;  %3111 = vmatpush3.bf16.msra.mxu1 %v3108_v17 }
0x165e   :  { %1659 = vst.msk [vmem:[#allocation4 + $0x10] sm:$0xff] %vm602_vm3, %v1657_v6  ;;  %v2345_v6 = vld [vmem:[#allocation11 + $0x30] sm:$0xff] }
0x1661   :  { %v1236_v32 = vpop.permute.xlu0 %1235  ;;  %v2079_v33 = vld [vmem:[#allocation4] sm:$0xff] }
0x1662   :  { %1239 = vst.msk [vmem:[#allocation4 + $0x20] sm:$0xff] %vm602_vm3, %v1236_v32  ;;  %2924 = vmatprep.mubr.msk.f32.mxu0 %vm2102_vm4, %v2079_v33  ;;  %v2346_v32 = vld [vmem:[#allocation11 + $0x38] sm:$0xff] }
0x1663   :  { %1343 = vst.msk [vmem:[#allocation4 + $0x20] sm:$0xff] %vm396_vm2, %v3892_v30  ;;  %2925 = vmatmul.mubr.msk.f32.vlgmr.msra.gmra.mrb[28].mxu0 %vm2102_vm4, %v2080_v37  ;;  %v2084_v30 = vld [vmem:[#allocation4 + $0x28] sm:$0xff]  ;;  %v3112_v33 = vpack.c.bf16 %v2346_v32, %v2345_v6  ;;  %v2347_v37 = vld [vmem:[#allocation11 + $0x40] sm:$0xff] }
0x1665   :  { %v812_v50 = vpop.permute.xlu0 %811  ;;  %v2081_v39 = vld [vmem:[#allocation4 + $0x10] sm:$0xff]  ;;  %3113 = vmatprep.subr.bf16.mxu1 %v3112_v33 }
0x1666   :  { %815 = vst.msk [vmem:[#allocation4 + $0x30] sm:$0xff] %vm602_vm3, %v812_v50  ;;  %2927 = vmatprep.mubr.msk.f32.mxu0 %vm2102_vm4, %v2081_v39  ;;  %v2348_v50 = vld [vmem:[#allocation11 + $0x48] sm:$0xff]  ;;  %3115 = vmatpush3.bf16.msra.mxu1 %v3112_v33 }
0x1667   :  { %1763 = vst.msk [vmem:[#allocation4 + $0x30] sm:$0xff] %vm396_vm2, %v3941_v41  ;;  %2928 = vmatmul.mubr.msk.f32.gmra.mrb[30].mxu0 %vm2102_vm4, %v2082_v40  ;;  %v2257_v41 = vand.u32 127, %v2256_v47  ;;  %v3116_v39 = vpack.c.bf16 %v2348_v50, %v2347_v37 }
0x1669   :  { %v1971_v42 = vpop.permute.xlu0 %1970  ;;  %vm2258_vm5 = vcmp.lt.s32.totalorder %v2257_v41, 16  ;;  %3117 = vmatprep.subr.bf16.mxu1 %v3116_v39 }
0x166a   :  { %1973 = vst.msk [vmem:[#allocation4 + $0x38] sm:$0xff] %vm396_vm2, %v1971_v42  ;;  %v2083_v44 = vld [vmem:[#allocation4 + $0x20] sm:$0xff]  ;;  %3119 = vmatpush3.bf16.msra.mxu1 %v3116_v39 }
0x166b   :  { %2930 = vmatprep.mubr.msk.f32.mxu0 %vm2102_vm4, %v2083_v44 }
0x166c   :  { %2931 = vmatmul.mubr.msk.f32.gmra.mrb[32].mxu0 %vm2102_vm4, %v2084_v30 }
0x166e   :  { %v2085_v34 = vld [vmem:[#allocation4 + $0x30] sm:$0xff] }
0x166f   :  { %2933 = vmatprep.mubr.msk.f32.mxu0 %vm2102_vm4, %v2085_v34 }
0x1671   :  { %v2086_v45 = vld [vmem:[#allocation4 + $0x38] sm:$0xff] }
0x1672   :  { %2934 = vmatmul.mubr.msk.f32.gmra.mrb[34].mxu0 %vm2102_vm4, %v2086_v45 }
0x1736   :  { %v2926_v0 = vpop.f32.mrb[28].mxu0 }
0x1737   :  { %v2199_v52 = vadd.f32 %v2926_v0, %v2551_v49  ;;  %v2193_v54 = vpop.f32.mrb[29].mxu0 }
0x1738   :  { %v2194_v46 = vadd.f32 %v2551_v49, %v2193_v54 }
0x1739   :  { %2233 = vst [vmem:[#allocation14 + $0x8] sm:$0xff] %v2199_v52  ;;  %v2249_v58 = vadd.f32 %v2241_v51, %v2199_v52 }
0x173a   :  { %2232 = vst [vmem:[#allocation14] sm:$0xff] %v2194_v46  ;;  %v2929_v60 = vpop.f32.mrb[30].mxu0  ;;  %v2248_v62 = vadd.f32 %v2240_v56, %v2194_v46 }
0x173b   :  { %v2209_v63 = vadd.f32 %v2929_v60, %v2551_v49  ;;  %v2203_v1 = vpop.f32.mrb[31].mxu0  ;;  %v4019_v59 = vsel %vm2258_vm5, %v2249_v58, -1e+30 }
0x173c   :  { %v2204_v31 = vadd.f32 %v2551_v49, %v2203_v1  ;;  %2269 = vmax.xlane.f32.xlu0 %v4019_v59  ;;  %v4023_v4 = vsel %vm2258_vm5, %v2248_v62, -1e+30 }
0x173d   :  { %2235 = vst [vmem:[#allocation14 + $0x18] sm:$0xff] %v2209_v63  ;;  %2267 = vmax.xlane.f32.xlu1 %v4023_v4  ;;  %v2251_v5 = vadd.f32 %v2243_v43, %v2209_v63 }
0x173e   :  { %2234 = vst [vmem:[#allocation14 + $0x10] sm:$0xff] %v2204_v31  ;;  %v2250_v53 = vadd.f32 %v2242_v2, %v2204_v31 }
0x173f   :  { %v2932_v61 = vpop.f32.mrb[32].mxu0  ;;  %v4027_v7 = vsel %vm2258_vm5, %v2251_v5, -1e+30 }
0x1740   :  { %v2219_v9 = vadd.f32 %v2932_v61, %v2551_v49  ;;  %v2213_v12 = vpop.f32.mrb[33].mxu0  ;;  %v4030_v10 = vsel %vm2258_vm5, %v2250_v53, -1e+30 }
0x1741   :  { %v2214_v20 = vadd.f32 %v2551_v49, %v2213_v12  ;;  %2271 = vmax.xlane.f32.xlu0 %v4030_v10  ;;  %2273 = vmax.xlane.f32.xlu1 %v4027_v7 }
0x1742   :  { %2237 = vst [vmem:[#allocation14 + $0x28] sm:$0xff] %v2219_v9  ;;  %v2253_v14 = vadd.f32 %v2245_v8, %v2219_v9 }
0x1743   :  { %2236 = vst [vmem:[#allocation14 + $0x20] sm:$0xff] %v2214_v20  ;;  %v2252_v15 = vadd.f32 %v2244_v11, %v2214_v20  ;;  %v2350_v11 = vld [vmem:[#allocation11 + $0x58] sm:$0xff] }
0x1744   :  { %v4035_v16 = vsel %vm2258_vm5, %v2253_v14, -1e+30  ;;  %v2351_v14 = vld [vmem:[#allocation11 + $0x60] sm:$0xff] }
0x1745   :  { %v2935_v24 = vpop.f32.mrb[34].mxu0  ;;  %2277 = vmax.xlane.f32.xlu1 %v4035_v16  ;;  %v2263_v21 = vsel %vm2258_vm5, %v2252_v15, -1e+30  ;;  %v2352_v15 = vld [vmem:[#allocation11 + $0x68] sm:$0xff] }
0x1746   :  { %v2229_v27 = vadd.f32 %v2935_v24, %v2551_v49  ;;  %v2223_v18 = vpop.f32.mrb[35].mxu0  ;;  %2275 = vmax.xlane.f32.xlu0 %v2263_v21  ;;  %v2353_v24 = vld [vmem:[#allocation11 + $0x70] sm:$0xff] }
0x1747   :  { %v2224_v19 = vadd.f32 %v2551_v49, %v2223_v18 }
0x1748   :  { %2239 = vst [vmem:[#allocation14 + $0x38] sm:$0xff] %v2229_v27  ;;  %v2255_v22 = vadd.f32 %v2247_v13, %v2229_v27 }
0x1749   :  { %2238 = vst [vmem:[#allocation14 + $0x30] sm:$0xff] %v2224_v19  ;;  %v2254_v26 = vadd.f32 %v2246_v57, %v2224_v19 }
0x174a   :  { %v2266_v3 = vsel %vm2258_vm5, %v2255_v22, -1e+30 }
0x174b   :  { %2281 = vmax.xlane.f32.xlu1 %v2266_v3  ;;  %v2265_v35 = vsel %vm2258_vm5, %v2254_v26, -1e+30 }
0x174c   :  { %2279 = vmax.xlane.f32.xlu0 %v2265_v35 }
0x17c9   :  { %v2270_v40 = vpop.xlane.xlu0 %2269 }
0x17ca   :  { %v2284_v42 = vsub.f32 %v4019_v59, %v2270_v40  ;;  %v2268_v44 = vpop.xlane.xlu1 %2267 }
0x17cb   :  { %v2283_v30 = vsub.f32 %v4023_v4, %v2268_v44 }
0x17cc   :  { %v2293_v34 = vmul.f32 1.442695, %v2284_v42 }
0x17cd   :  { %v2291_v45 = vmul.f32 1.442695, %v2283_v30 }
0x17ce   :  { %3276 = vpow2.f32 %v2293_v34  ;;  %v2272_v47 = vpop.xlane.xlu0 %2271  ;;  %v2274_v49 = vpop.xlane.xlu1 %2273 }
0x17cf   :  { %3278 = vpow2.f32 %v2291_v45  ;;  %v2285_v41 = vsub.f32 %v4030_v10, %v2272_v47  ;;  %v2286_v0 = vsub.f32 %v4027_v7, %v2274_v49  ;;  %v2349_v10 = vld [vmem:[#allocation11 + $0x50] sm:$0xff] }
0x17d0   :  { %v3120_v20 = vpack.c.bf16 %v2350_v11, %v2349_v10 }
0x17d1   :  { %v2295_v51 = vmul.f32 1.442695, %v2285_v41  ;;  %v2297_v52 = vmul.f32 1.442695, %v2286_v0 }
0x17d2   :  { %v2278_v54 = vpop.xlane.xlu1 %2277  ;;  %3121 = vmatprep.subr.bf16.mxu1 %v3120_v20 }
0x17d3   :  { %3280 = vpow2.f32 %v2295_v51  ;;  %v2288_v56 = vsub.f32 %v4035_v16, %v2278_v54  ;;  %v2276_v46 = vpop.xlane.xlu0 %2275  ;;  %3123 = vmatpush3.bf16.msra.mxu1 %v3120_v20  ;;  %v3124_v16 = vpack.c.bf16 %v2352_v15, %v2351_v14 }
0x17d4   :  { %3282 = vpow2.f32 %v2297_v52  ;;  %v2287_v58 = vsub.f32 %v2263_v21, %v2276_v46  ;;  %v2354_v21 = vld [vmem:[#allocation11 + $0x78] sm:$0xff] }
0x17d5   :  { %v2301_v60 = vmul.f32 1.442695, %v2288_v56  ;;  %3125 = vmatprep.subr.bf16.mxu1 %v3124_v16  ;;  %v3128_v13 = vpack.c.bf16 %v2354_v21, %v2353_v24 }
0x17d6   :  { %v2299_v62 = vmul.f32 1.442695, %v2287_v58 }
0x17d7   :  { %3284 = vpow2.f32 %v2301_v60  ;;  %3127 = vmatpush3.bf16.msra.mxu1 %v3124_v16 }
0x17d8   :  { %v3277_v43 = vpop.eup %3276  ;;  %3286 = vpow2.f32 %v2299_v62  ;;  %v2282_v63 = vpop.xlane.xlu1 %2281  ;;  %3129 = vmatprep.subr.bf16.mxu1 %v3128_v13 }
0x17d9   :  { %v3279_v1 = vpop.eup %3278  ;;  %v2290_v59 = vsub.f32 %v2266_v3, %v2282_v63  ;;  %v2280_v2 = vpop.xlane.xlu0 %2279  ;;  %2309 = vadd.xlane.f32.xlu1 %v3277_v43 }
0x17da   :  { %v2289_v31 = vsub.f32 %v2265_v35, %v2280_v2  ;;  %2307 = vadd.xlane.f32.xlu0 %v3279_v1 }
0x17db   :  { %v2305_v4 = vmul.f32 1.442695, %v2290_v59  ;;  %3131 = vmatpush3.bf16.msra.mxu1 %v3128_v13 }
0x17dc   :  { %v2303_v5 = vmul.f32 1.442695, %v2289_v31 }
0x17dd   :  { %v3281_v53 = vpop.eup %3280  ;;  %3288 = vpow2.f32 %v2305_v4 }
0x17de   :  { %v3283_v61 = vpop.eup %3282  ;;  %3290 = vpow2.f32 %v2303_v5  ;;  %2311 = vadd.xlane.f32.xlu0 %v3281_v53 }
0x17df   :  { %2313 = vadd.xlane.f32.xlu1 %v3283_v61 }
0x17e1   :  { %v3285_v7 = vpop.eup %3284 }
0x17e2   :  { %v3287_v8 = vpop.eup %3286 }
0x17e3   :  { %2317 = vadd.xlane.f32.xlu1 %v3285_v7  ;;  %2315 = vadd.xlane.f32.xlu0 %v3287_v8 }
0x17e7   :  { %v3289_v9 = vpop.eup %3288 }
0x17e8   :  { %v3291_v12 = vpop.eup %3290  ;;  %2321 = vadd.xlane.f32.xlu1 %v3289_v9 }
0x17e9   :  { %2319 = vadd.xlane.f32.xlu0 %v3291_v12 }
0x1866   :  { %v2310_v27 = vpop.xlane.xlu1 %2309 }
0x1867   :  { %3292 = vrcp.f32 %v2310_v27  ;;  %v2308_v18 = vpop.xlane.xlu0 %2307 }
0x1868   :  { %3294 = vrcp.f32 %v2308_v18 }
0x186b   :  { %v2312_v57 = vpop.xlane.xlu0 %2311 }
0x186c   :  { %3296 = vrcp.f32 %v2312_v57  ;;  %v2314_v19 = vpop.xlane.xlu1 %2313 }
0x186d   :  { %3298 = vrcp.f32 %v2314_v19 }
0x1870   :  { %v2318_v22 = vpop.xlane.xlu1 %2317  ;;  %v2316_v26 = vpop.xlane.xlu0 %2315 }
0x1871   :  { %v3293_v3 = vpop.eup %3292  ;;  %3300 = vrcp.f32 %v2318_v22 }
0x1872   :  { %v3295_v35 = vpop.eup %3294  ;;  %3302 = vrcp.f32 %v2316_v26  ;;  %v2332_v36 = vmul.f32 %v3293_v3, %v3277_v43 }
0x1873   :  { %v2331_v23 = vmul.f32 %v3295_v35, %v3279_v1 }
0x1875   :  { %2968 = vmatprep.mubr.f32.mxu1 %v2331_v23  ;;  %v2322_v55 = vpop.xlane.xlu1 %2321 }
0x1876   :  { %v3297_v25 = vpop.eup %3296  ;;  %3304 = vrcp.f32 %v2322_v55  ;;  %v2320_v28 = vpop.xlane.xlu0 %2319  ;;  %2969 = vmatmul.mubr.f32.vlgmr.msra.gmra.mrb[20].mxu1 %v2332_v36 }
0x1877   :  { %v3299_v29 = vpop.eup %3298  ;;  %3306 = vrcp.f32 %v2320_v28  ;;  %v2333_v38 = vmul.f32 %v3297_v25, %v3281_v53 }
0x1878   :  { %v2334_v48 = vmul.f32 %v3299_v29, %v3283_v61 }
0x1879   :  { %2971 = vmatprep.mubr.f32.mxu1 %v2333_v38 }
0x187a   :  { %2972 = vmatmul.mubr.f32.gmra.mrb[22].mxu1 %v2334_v48 }
0x187b   :  { %v3301_v17 = vpop.eup %3300 }
0x187c   :  { %v3303_v6 = vpop.eup %3302  ;;  %v2336_v33 = vmul.f32 %v3301_v17, %v3285_v7 }
0x187d   :  { %v2335_v32 = vmul.f32 %v3303_v6, %v3287_v8 }
0x187f   :  { %2974 = vmatprep.mubr.f32.mxu1 %v2335_v32 }
0x1880   :  { %v3305_v37 = vpop.eup %3304  ;;  %2975 = vmatmul.mubr.f32.gmra.mrb[24].mxu1 %v2336_v33 }
0x1881   :  { %v3307_v50 = vpop.eup %3306  ;;  %v2338_v40 = vmul.f32 %v3305_v37, %v3289_v9 }
0x1882   :  { %v2337_v39 = vmul.f32 %v3307_v50, %v3291_v12 }
0x1884   :  { %2977 = vmatprep.mubr.f32.mxu1 %v2337_v39 }
0x1885   :  { %2978 = vmatmul.mubr.f32.gmra.mrb[26].mxu1 %v2338_v40 }
0x1886   :  { %3429 = shalt.err (!%p3426_p2)
}
0x1887   :  { %s3430_s13 = scalar_lea.hbm %s4087_s11, 1024 }
0x1888   :  { %p3431_p3 = scmp.ne.s32.totalorder %s4087_s11, %s3430_s13  ;;  %p3434_p4 = scmp.lt.u32.totalorder %s3430_s13, %s4087_s11 }
0x188a   :  { %p3436_p5 = pnand %p3434_p4, %p3431_p3 }
0x188c   :  { %3439 = shalt.err (!%p3436_p5)
}
0x188d   :  { %2479 = dma.vmem_to_hbm [thread:$0]  %s2474_s4, 1024, %s4087_s11, [#allocation7], %s3474_s15, %s3474_s15, %s3475_s16  }
0x188e   :  { %s3485_s30 = smov [#allocation15]  }
0x188f   :  { %s2485_s19 = sshll.u32 %s3485_s30, 4  ;;  %s2486_s19 = int_to_ptr.vmem [resolvable:$true] %s2485_s19 }
0x1890   :  { %s3440_s11 = scalar_lea.vmem %s2486_s19, 1024  ;;  %p3445_p7 = scmp.lt.s32.totalorder %s2486_s19, %s2486_s19 }
0x1891   :  { %p3441_p6 = scmp.ne.s32.totalorder %s2486_s19, %s3440_s11  ;;  %p3446_p8 = scmp.lt.s32.totalorder %s3440_s11, %s3440_s11 }
0x1893   :  { %p3447_p9 = por %p3446_p8, %p3445_p7 }
0x1895   :  { %p3448_p10 = pnand %p3447_p9, %p3441_p6 }
0x1949   :  { %v2970_v42 = vpop.f32.mrb[20].mxu1 }
0x194a   :  { %2461 = vst [vmem:[#allocation15 + $0x8] sm:$0xff] %v2970_v42  ;;  %v2421_v44 = vpop.f32.mrb[21].mxu1 }
0x194b   :  { %2460 = vst [vmem:[#allocation15] sm:$0xff] %v2421_v44 }
0x194d   :  { %v2973_v30 = vpop.f32.mrb[22].mxu1 }
0x194e   :  { %2463 = vst [vmem:[#allocation15 + $0x18] sm:$0xff] %v2973_v30  ;;  %v2431_v34 = vpop.f32.mrb[23].mxu1 }
0x194f   :  { %2462 = vst [vmem:[#allocation15 + $0x10] sm:$0xff] %v2431_v34 }
0x1953   :  { %v2976_v45 = vpop.f32.mrb[24].mxu1 }
0x1954   :  { %2465 = vst [vmem:[#allocation15 + $0x28] sm:$0xff] %v2976_v45  ;;  %v2441_v47 = vpop.f32.mrb[25].mxu1 }
0x1955   :  { %2464 = vst [vmem:[#allocation15 + $0x20] sm:$0xff] %v2441_v47 }
0x1958   :  { %v2979_v49 = vpop.f32.mrb[26].mxu1 }
0x1959   :  { %2467 = vst [vmem:[#allocation15 + $0x38] sm:$0xff] %v2979_v49  ;;  %v2451_v41 = vpop.f32.mrb[27].mxu1 }
0x195a   :  { %2466 = vst [vmem:[#allocation15 + $0x30] sm:$0xff] %v2451_v41 }
0x195b   :  { %3451 = shalt.err (!%p3448_p10)
}
0x195c   :  { %s3452_s23 = scalar_lea.hbm %s4088_s12, 1024 }
0x195d   :  { %p3453_p11 = scmp.ne.s32.totalorder %s4088_s12, %s3452_s23  ;;  %p3456_p12 = scmp.lt.u32.totalorder %s3452_s23, %s4088_s12 }
0x195f   :  { %p3458_p13 = pnand %p3456_p12, %p3453_p11 }
0x1961   :  { %3461 = shalt.err (!%p3458_p13)
}
0x1962   :  { %2491 = dma.vmem_to_hbm [thread:$0]  %s2486_s19, 1024, %s4088_s12, [#allocation16], %s3474_s15, %s3474_s15, %s3475_s16  }
0x1963   :  { %3468 = dma.done.wait [#allocation7], 1024  }
0x1964   :  { %3469 = vsyncadd [#allocation7], 4294966272 }
0x1965   :  { %3470 = dma.done.wait [#allocation16], 1024  }
0x1966   :  { %3471 = vsyncadd [#allocation16], 4294966272 }
0x1967   :  { %2498 = vsyncpa [#allocation6], 1 }
0x1968   :  { %2499 = vsyncpa [#allocation9], 1 }
0x1969   :  { %2500 = vsyncpa [#allocation12], 1 }
0x196a   :  { %2501 = vsyncpa [#allocation7], 1 }
0x196b   :  { %2502 = vsyncpa [#allocation16], 1 }

</bundles_post_ra>
